<compile_context>
chip_gen: v7x
topology: tpu7x:2x2x1
jax: 0.10.0
libtpu: 0.0.40
codegen_flags: <defaults>
</compile_context>

<pallas_src>
import functools

import jax
import jax.numpy as jnp
from jax import lax
from jax.experimental import pallas as pl
from jax.experimental.pallas import tpu as pltpu

EPS = 1e-5
# Channel counts padded to the bf16 sublane tile (16) so in-kernel tap stacking
# (sublane-axis concatenate) is tile-aligned.  Zero channels / zero weight rows
# are mathematically inert and get cropped by the wrapper.
CH_ALIGN = 16
# Flattened padded-spatial (lane) axis padded to a multiple of 256 -> dense
# vregs, unmasked stores, MXU-N tiles matching the 256-wide array on v6e/v7x.
LANE_ALIGN = 256


def _round_up(v, m):
    return (v + m - 1) // m * m


# ----------------------------------------------------------------------------
# Fused DoubleConv2d kernel.
# ----------------------------------------------------------------------------
def _double_conv_kernel(x_ref, w1_ref, w2_ref, mrow_ref, mcol_ref, out_ref, *,
                        wp, inv_count):
    """One fused DoubleConv2d on a fully VMEM-resident block.

    x_ref:    (Cin_p, L)  bf16  zero-padded input; L = round_up(N*(H+2)*(W+2)),
                                flattened padded spatial on the lane axis.
    w1_ref:   (G1, Cmid_p, (9/G1)*Cin_p)  bf16  conv1 weights, row-group packed.
    w2_ref:   (G2, Cout_p, (9/G2)*Cmid_p) bf16  conv2 weights, same packing.
    mrow_ref: (1, L) f32   1.0 at interior (valid output) columns.
    mcol_ref: (L, 1) f32   same mask as a column (MXU-side BN reductions).
    out_ref:  (Cout_p, L) bf16  result (border columns garbage; wrapper crops).
    wp:        W + 2 (static);  inv_count: 1/(N*H*W) (static float).
    """
    mrow = mrow_ref[...]
    mcol = mcol_ref[...]

    def shift_lanes(z, s):
        # taps_s[:, j] = z[:, j + s] for all interior columns.  The circular
        # wrap of jnp.roll only lands in border / lane-padding columns, which
        # are masked out of the BN statistics and cropped by the wrapper.
        return z if s == 0 else jnp.roll(z, -s, axis=1)

    def conv3x3(zb, w_ref_):
        # Unrolled accumulation over kernel-row groups: each pass builds only
        # that group's taps in VMEM (sublane-tile-aligned concat) and issues a
        # single MXU matmul (bf16 in, f32 accumulate).
        groups = w_ref_.shape[0]           # 1 (all 9 taps) or 3 (one row each)
        rows = 3 // groups
        acc = None
        for gi in range(groups):
            shifts = [(kh - 1) * wp + (kw - 1)
                      for kh in range(gi * rows, (gi + 1) * rows)
                      for kw in range(3)]
            taps = jnp.concatenate([shift_lanes(zb, s) for s in shifts], axis=0)
            part = jnp.dot(w_ref_[gi], taps, preferred_element_type=jnp.float32)
            acc = part if acc is None else acc + part
        return acc

    def bn_relu(y, zero_border):
        # Training-mode BatchNorm (batch stats, biased var, gamma=1, beta=0).
        # Masked reductions run on the MXU (idle during BN), keeping the VPU
        # free; stats are over valid columns only (mask column is 0/1).
        mean = jnp.dot(y, mcol, preferred_element_type=jnp.float32) * inv_count
        d = y - mean
        var = jnp.dot(d * d, mcol, preferred_element_type=jnp.float32) * inv_count
        z = jnp.maximum(d * lax.rsqrt(var + EPS), 0.0)
        # Re-zero border columns only when the result feeds conv2 (those zeros
        # ARE conv2's padding); the final output is cropped by the wrapper.
        return z * mrow if zero_border else z

    z1 = bn_relu(conv3x3(x_ref[...], w1_ref), zero_border=True)
    z2 = bn_relu(conv3x3(z1.astype(jnp.bfloat16), w2_ref), zero_border=False)
    out_ref[...] = z2.astype(out_ref.dtype)


# ----------------------------------------------------------------------------
# Host-side glue (pure layout plumbing, no compute; all bf16).
# ----------------------------------------------------------------------------
def _flatten_padded(x_nchw, cin_p, lanes):
    n, c, h, w = x_nchw.shape
    xb = x_nchw.astype(jnp.bfloat16)                      # cast BEFORE plumbing
    xp = jnp.pad(xb, ((0, 0), (0, cin_p - c), (1, 1), (1, 1)))
    xp = xp.reshape(n, cin_p, (h + 2) * (w + 2))
    xp = jnp.transpose(xp, (1, 0, 2)).reshape(cin_p, n * (h + 2) * (w + 2))
    return jnp.pad(xp, ((0, 0), (0, lanes - xp.shape[1])))


def _pack_weight(w_hwio, cin_p, cout_p, groups):
    # (3, 3, Cin, Cout) -> zero-pad channels -> (G, Cout_p, (9/G)*Cin_p),
    # (kh-within-group, kw, cin)-major to match the in-kernel tap order.
    _, _, cin, cout = w_hwio.shape
    rows = 3 // groups
    wpd = jnp.pad(w_hwio.astype(jnp.bfloat16),
                  ((0, 0), (0, 0), (0, cin_p - cin), (0, cout_p - cout)))
    wt = jnp.transpose(wpd, (0, 3, 1, 2))                 # (kh, Cout_p, kw, Cin_p)
    wt = wt.reshape(groups, rows, cout_p, 3, cin_p)
    wt = jnp.transpose(wt, (0, 2, 1, 3, 4))               # (G, Cout_p, rows, kw, Cin_p)
    return wt.reshape(groups, cout_p, rows * 3 * cin_p)


def _make_mask(n, h, w, lanes):
    hp, wp = h + 2, w + 2
    m = jnp.zeros((hp, wp), jnp.float32).at[1:h + 1, 1:w + 1].set(1.0)
    m = jnp.tile(m.reshape(1, hp * wp), (1, n))           # (1, N*P)
    return jnp.pad(m, ((0, 0), (0, lanes - n * hp * wp)))  # (1, L)


# ----------------------------------------------------------------------------
# Full DoubleConv2d forward (NCHW in / NCHW out like the PyTorch module).
# Returns bf16 (downstream UNet blocks consume bf16).
# ----------------------------------------------------------------------------
@jax.jit
def double_conv2d(x_nchw, w1_hwio, w2_hwio):
    n, cin, h, w = x_nchw.shape
    cmid, cout = w1_hwio.shape[3], w2_hwio.shape[3]
    cin_p, cmid_p, cout_p = (_round_up(c, CH_ALIGN) for c in (cin, cmid, cout))
    hp, wp = h + 2, w + 2
    npx = n * hp * wp
    lanes = _round_up(npx, LANE_ALIGN)
    inv_count = 1.0 / float(n * h * w)

    # Kernel-row grouping: per-row (K = 3*Cin_p) when that keeps the MXU K-dim
    # >= 128, otherwise one full 9-tap group (narrow-channel stem convs).
    g1 = 3 if 3 * cin_p >= 128 else 1
    g2 = 3 if 3 * cmid_p >= 128 else 1

    xflat = _flatten_padded(x_nchw, cin_p, lanes)          # (Cin_p, L)  bf16
    w1m = _pack_weight(w1_hwio, cin_p, cmid_p, g1)         # (G1, Cmid_p, ...) bf16
    w2m = _pack_weight(w2_hwio, cmid_p, cout_p, g2)        # (G2, Cout_p, ...) bf16
    mrow = _make_mask(n, h, w, lanes)                      # (1, L) f32
    mcol = mrow.reshape(lanes, 1)                          # (L, 1) f32

    kernel = functools.partial(_double_conv_kernel, wp=wp, inv_count=inv_count)

    out_flat = pl.pallas_call(
        kernel,
        out_shape=jax.ShapeDtypeStruct((cout_p, lanes), jnp.bfloat16),
        grid=(1,),
        in_specs=[
            pl.BlockSpec((cin_p, lanes), lambda i: (0, 0)),
            pl.BlockSpec((g1, cmid_p, (9 // g1) * cin_p), lambda i: (0, 0, 0)),
            pl.BlockSpec((g2, cout_p, (9 // g2) * cmid_p), lambda i: (0, 0, 0)),
            pl.BlockSpec((1, lanes), lambda i: (0, 0)),
            pl.BlockSpec((lanes, 1), lambda i: (0, 0)),
        ],
        out_specs=pl.BlockSpec((cout_p, lanes), lambda i: (0, 0)),
        compiler_params=pltpu.CompilerParams(
            dimension_semantics=("arbitrary",),
        ),
    )(xflat, w1m, w2m, mrow, mcol)

    # (Cout_p, L) bf16 -> crop channels + interior spatial -> (N, Cout, H, W).
    out = out_flat[:cout, :npx].reshape(cout, n, hp, wp)[:, :, 1:h + 1, 1:w + 1]
    return jnp.transpose(out, (1, 0, 2, 3))


# ----------------------------------------------------------------------------
# Pure-JAX reference with the same numerics (bf16 conv operands, f32 accum,
# training-mode BatchNorm) for verification.
# ----------------------------------------------------------------------------
def _reference(x_nchw, w1_hwio, w2_hwio):
    def conv(x_nhwc, w):
        return lax.conv_general_dilated(
            x_nhwc.astype(jnp.bfloat16), w.astype(jnp.bfloat16),
            window_strides=(1, 1), padding=((1, 1), (1, 1)),
            dimension_numbers=("NHWC", "HWIO", "NHWC"),
            preferred_element_type=jnp.float32)

    def bnr(y):
        mean = jnp.mean(y, axis=(0, 1, 2))
        var = jnp.mean((y - mean) ** 2, axis=(0, 1, 2))
        return jnp.maximum((y - mean) / jnp.sqrt(var + EPS), 0.0)

    x = jnp.transpose(x_nchw, (0, 2, 3, 1))
    z = bnr(conv(x, w1_hwio))
    z = bnr(conv(z, w2_hwio))
    return jnp.transpose(z, (0, 3, 1, 2))


if __name__ == "__main__":
    key = jax.random.PRNGKey(0)
    k1, k2, k3, k4, k5 = jax.random.split(key, 5)

    N, C_IN, C_MID, C_OUT, H, W = 2, 4, 8, 8, 16, 16

    x = jax.random.normal(k1, (N, C_IN, H, W), jnp.float32)
    # Synthetic Conv2d weights (bias=False), stored as HWIO for the kernels.
    w1 = jax.random.normal(k2, (3, 3, C_IN, C_MID), jnp.float32) * 0.1
    w2 = jax.random.normal(k3, (3, 3, C_MID, C_OUT), jnp.float32) * 0.1

    out = jax.block_until_ready(double_conv2d(x, w1, w2))
    ref = jax.block_until_ready(_reference(x, w1, w2))
    assert out.shape == (N, C_OUT, H, W), out.shape
    err_small = float(jnp.max(jnp.abs(out.astype(jnp.float32) - ref)))

    # UNet stem-sized block (DoubleConv2d(in_channels, 64), i.e. `self.i`);
    # exercises the per-row (G=3) grouping path for conv2.
    w1s = jax.random.normal(k4, (3, 3, C_IN, 64), jnp.float32) * 0.1
    w2s = jax.random.normal(k5, (3, 3, 64, 64), jnp.float32) * 0.05
    out_s = jax.block_until_ready(double_conv2d(x, w1s, w2s))
    ref_s = jax.block_until_ready(_reference(x, w1s, w2s))
    assert out_s.shape == (N, 64, H, W), out_s.shape
    err_stem = float(jnp.max(jnp.abs(out_s.astype(jnp.float32) - ref_s)))

    # bf16 MXU operands + bf16 output vs the f32 reference: tolerance covers
    # ~2^-9 relative rounding of unit-variance post-BN activations (|z| <~ 5)
    # on top of the bf16 conv accumulation error.
    if max(err_small, err_stem) < 5e-2:
        print("KERNEL_OK")
    else:
        print(f"MISMATCH err_small={err_small} err_stem={err_stem}")
</pallas_src>

<mosaic_0001>
module attributes {stable_mosaic.version = 11 : i64} {
  func.func @_double_conv_kernel(%arg0: i32, %arg1: memref<16x768xbf16, #tpu.memory_space<vmem>>, %arg2: memref<1x16x144xbf16, #tpu.memory_space<vmem>>, %arg3: memref<1x16x144xbf16, #tpu.memory_space<vmem>>, %arg4: memref<1x768xf32, #tpu.memory_space<vmem>>, %arg5: memref<768x1xf32, #tpu.memory_space<vmem>>, %arg6: memref<16x768xbf16, #tpu.memory_space<vmem>>) attributes {dimension_semantics = [#tpu.dimension_semantics<arbitrary>], iteration_bounds = array<i64: 1>, scalar_prefetch = 0 : i64, scratch_operands = 0 : i64, tpu.core_type = #tpu.core_type<tc>, window_params = [{pipeline_mode = #tpu.pipeline_mode<synchronous>, transform_indices = @transform_0, window_bounds = array<i64: 16, 768>}, {pipeline_mode = #tpu.pipeline_mode<synchronous>, transform_indices = @transform_1, window_bounds = array<i64: 1, 16, 144>}, {pipeline_mode = #tpu.pipeline_mode<synchronous>, transform_indices = @transform_2, window_bounds = array<i64: 1, 16, 144>}, {pipeline_mode = #tpu.pipeline_mode<synchronous>, transform_indices = @transform_3, window_bounds = array<i64: 1, 768>}, {pipeline_mode = #tpu.pipeline_mode<synchronous>, transform_indices = @transform_4, window_bounds = array<i64: 768, 1>}, {pipeline_mode = #tpu.pipeline_mode<synchronous>, transform_indices = @transform_5, window_bounds = array<i64: 16, 768>}]} {
    %c0 = arith.constant 0 : index
    %c0_0 = arith.constant 0 : index
    %0 = vector.load %arg4[%c0, %c0_0] : memref<1x768xf32, #tpu.memory_space<vmem>>, vector<1x768xf32>
    %c0_1 = arith.constant 0 : index
    %c0_2 = arith.constant 0 : index
    %1 = vector.load %arg5[%c0_1, %c0_2] : memref<768x1xf32, #tpu.memory_space<vmem>>, vector<768x1xf32>
    %c0_3 = arith.constant 0 : index
    %c0_4 = arith.constant 0 : index
    %2 = vector.load %arg1[%c0_3, %c0_4] : memref<16x768xbf16, #tpu.memory_space<vmem>>, vector<16x768xbf16>
    %3 = vector.extract_strided_slice %2 {offsets = [0, 749], sizes = [16, 19], strides = [1, 1]} : vector<16x768xbf16> to vector<16x19xbf16>
    %4 = vector.extract_strided_slice %2 {offsets = [0, 0], sizes = [16, 749], strides = [1, 1]} : vector<16x768xbf16> to vector<16x749xbf16>
    %5 = tpu.concatenate %3, %4 in 1 : vector<16x19xbf16>, vector<16x749xbf16> -> vector<16x768xbf16>
    %6 = vector.extract_strided_slice %2 {offsets = [0, 750], sizes = [16, 18], strides = [1, 1]} : vector<16x768xbf16> to vector<16x18xbf16>
    %7 = vector.extract_strided_slice %2 {offsets = [0, 0], sizes = [16, 750], strides = [1, 1]} : vector<16x768xbf16> to vector<16x750xbf16>
    %8 = tpu.concatenate %6, %7 in 1 : vector<16x18xbf16>, vector<16x750xbf16> -> vector<16x768xbf16>
    %9 = vector.extract_strided_slice %2 {offsets = [0, 751], sizes = [16, 17], strides = [1, 1]} : vector<16x768xbf16> to vector<16x17xbf16>
    %10 = vector.extract_strided_slice %2 {offsets = [0, 0], sizes = [16, 751], strides = [1, 1]} : vector<16x768xbf16> to vector<16x751xbf16>
    %11 = tpu.concatenate %9, %10 in 1 : vector<16x17xbf16>, vector<16x751xbf16> -> vector<16x768xbf16>
    %12 = vector.extract_strided_slice %2 {offsets = [0, 767], sizes = [16, 1], strides = [1, 1]} : vector<16x768xbf16> to vector<16x1xbf16>
    %13 = vector.extract_strided_slice %2 {offsets = [0, 0], sizes = [16, 767], strides = [1, 1]} : vector<16x768xbf16> to vector<16x767xbf16>
    %14 = tpu.concatenate %12, %13 in 1 : vector<16x1xbf16>, vector<16x767xbf16> -> vector<16x768xbf16>
    %15 = vector.extract_strided_slice %2 {offsets = [0, 1], sizes = [16, 767], strides = [1, 1]} : vector<16x768xbf16> to vector<16x767xbf16>
    %16 = vector.extract_strided_slice %2 {offsets = [0, 0], sizes = [16, 1], strides = [1, 1]} : vector<16x768xbf16> to vector<16x1xbf16>
    %17 = tpu.concatenate %15, %16 in 1 : vector<16x767xbf16>, vector<16x1xbf16> -> vector<16x768xbf16>
    %18 = vector.extract_strided_slice %2 {offsets = [0, 17], sizes = [16, 751], strides = [1, 1]} : vector<16x768xbf16> to vector<16x751xbf16>
    %19 = vector.extract_strided_slice %2 {offsets = [0, 0], sizes = [16, 17], strides = [1, 1]} : vector<16x768xbf16> to vector<16x17xbf16>
    %20 = tpu.concatenate %18, %19 in 1 : vector<16x751xbf16>, vector<16x17xbf16> -> vector<16x768xbf16>
    %21 = vector.extract_strided_slice %2 {offsets = [0, 18], sizes = [16, 750], strides = [1, 1]} : vector<16x768xbf16> to vector<16x750xbf16>
    %22 = vector.extract_strided_slice %2 {offsets = [0, 0], sizes = [16, 18], strides = [1, 1]} : vector<16x768xbf16> to vector<16x18xbf16>
    %23 = tpu.concatenate %21, %22 in 1 : vector<16x750xbf16>, vector<16x18xbf16> -> vector<16x768xbf16>
    %24 = vector.extract_strided_slice %2 {offsets = [0, 19], sizes = [16, 749], strides = [1, 1]} : vector<16x768xbf16> to vector<16x749xbf16>
    %25 = vector.extract_strided_slice %2 {offsets = [0, 0], sizes = [16, 19], strides = [1, 1]} : vector<16x768xbf16> to vector<16x19xbf16>
    %26 = tpu.concatenate %24, %25 in 1 : vector<16x749xbf16>, vector<16x19xbf16> -> vector<16x768xbf16>
    %27 = tpu.concatenate %5, %8, %11, %14, %2, %17, %20, %23, %26 in 0 : vector<16x768xbf16>, vector<16x768xbf16>, vector<16x768xbf16>, vector<16x768xbf16>, vector<16x768xbf16>, vector<16x768xbf16>, vector<16x768xbf16>, vector<16x768xbf16>, vector<16x768xbf16> -> vector<144x768xbf16>
    %c0_5 = arith.constant 0 : index
    %c0_6 = arith.constant 0 : index
    %c0_7 = arith.constant 0 : index
    %28 = vector.load %arg2[%c0_5, %c0_6, %c0_7] : memref<1x16x144xbf16, #tpu.memory_space<vmem>>, vector<1x16x144xbf16>
    %29 = vector.shape_cast %28 : vector<1x16x144xbf16> to vector<16x144xbf16>
    %cst = arith.constant dense<0.000000e+00> : vector<16x768xf32>
    %30 = tpu.matmul %29, %27, %cst {dimension_numbers = #tpu.dot_dimension_numbers<[1], [0], [0], [1], [0, 0, 1, 1], [], []>} : vector<16x144xbf16>, vector<144x768xbf16>, vector<16x768xf32> -> vector<16x768xf32>
    %cst_8 = arith.constant dense<0.000000e+00> : vector<16x1xf32>
    %31 = tpu.matmul %30, %1, %cst_8 {dimension_numbers = #tpu.dot_dimension_numbers<[1], [0], [0], [1], [0, 0, 1, 1], [], []>} : vector<16x768xf32>, vector<768x1xf32>, vector<16x1xf32> -> vector<16x1xf32>
    %cst_9 = arith.constant 0.001953125 : f32
    %32 = vector.broadcast %cst_9 : f32 to vector<16x1xf32>
    %33 = arith.mulf %31, %32 : vector<16x1xf32>
    %34 = vector.broadcast %33 : vector<16x1xf32> to vector<16x768xf32>
    %35 = arith.subf %30, %34 : vector<16x768xf32>
    %36 = arith.mulf %35, %35 : vector<16x768xf32>
    %cst_10 = arith.constant dense<0.000000e+00> : vector<16x1xf32>
    %37 = tpu.matmul %36, %1, %cst_10 {dimension_numbers = #tpu.dot_dimension_numbers<[1], [0], [0], [1], [0, 0, 1, 1], [], []>} : vector<16x768xf32>, vector<768x1xf32>, vector<16x1xf32> -> vector<16x1xf32>
    %cst_11 = arith.constant 0.001953125 : f32
    %38 = vector.broadcast %cst_11 : f32 to vector<16x1xf32>
    %39 = arith.mulf %37, %38 : vector<16x1xf32>
    %cst_12 = arith.constant 9.99999974E-6 : f32
    %40 = vector.broadcast %cst_12 : f32 to vector<16x1xf32>
    %41 = arith.addf %39, %40 : vector<16x1xf32>
    %42 = math.rsqrt %41 : vector<16x1xf32>
    %43 = vector.broadcast %42 : vector<16x1xf32> to vector<16x768xf32>
    %44 = arith.mulf %35, %43 : vector<16x768xf32>
    %cst_13 = arith.constant 0.000000e+00 : f32
    %45 = vector.broadcast %cst_13 : f32 to vector<16x768xf32>
    %46 = arith.maximumf %44, %45 : vector<16x768xf32>
    %47 = vector.broadcast %0 : vector<1x768xf32> to vector<16x768xf32>
    %48 = arith.mulf %46, %47 : vector<16x768xf32>
    %49 = arith.truncf %48 : vector<16x768xf32> to vector<16x768xbf16>
    %50 = vector.extract_strided_slice %49 {offsets = [0, 749], sizes = [16, 19], strides = [1, 1]} : vector<16x768xbf16> to vector<16x19xbf16>
    %51 = vector.extract_strided_slice %49 {offsets = [0, 0], sizes = [16, 749], strides = [1, 1]} : vector<16x768xbf16> to vector<16x749xbf16>
    %52 = tpu.concatenate %50, %51 in 1 : vector<16x19xbf16>, vector<16x749xbf16> -> vector<16x768xbf16>
    %53 = vector.extract_strided_slice %49 {offsets = [0, 750], sizes = [16, 18], strides = [1, 1]} : vector<16x768xbf16> to vector<16x18xbf16>
    %54 = vector.extract_strided_slice %49 {offsets = [0, 0], sizes = [16, 750], strides = [1, 1]} : vector<16x768xbf16> to vector<16x750xbf16>
    %55 = tpu.concatenate %53, %54 in 1 : vector<16x18xbf16>, vector<16x750xbf16> -> vector<16x768xbf16>
    %56 = vector.extract_strided_slice %49 {offsets = [0, 751], sizes = [16, 17], strides = [1, 1]} : vector<16x768xbf16> to vector<16x17xbf16>
    %57 = vector.extract_strided_slice %49 {offsets = [0, 0], sizes = [16, 751], strides = [1, 1]} : vector<16x768xbf16> to vector<16x751xbf16>
    %58 = tpu.concatenate %56, %57 in 1 : vector<16x17xbf16>, vector<16x751xbf16> -> vector<16x768xbf16>
    %59 = vector.extract_strided_slice %49 {offsets = [0, 767], sizes = [16, 1], strides = [1, 1]} : vector<16x768xbf16> to vector<16x1xbf16>
    %60 = vector.extract_strided_slice %49 {offsets = [0, 0], sizes = [16, 767], strides = [1, 1]} : vector<16x768xbf16> to vector<16x767xbf16>
    %61 = tpu.concatenate %59, %60 in 1 : vector<16x1xbf16>, vector<16x767xbf16> -> vector<16x768xbf16>
    %62 = vector.extract_strided_slice %49 {offsets = [0, 1], sizes = [16, 767], strides = [1, 1]} : vector<16x768xbf16> to vector<16x767xbf16>
    %63 = vector.extract_strided_slice %49 {offsets = [0, 0], sizes = [16, 1], strides = [1, 1]} : vector<16x768xbf16> to vector<16x1xbf16>
    %64 = tpu.concatenate %62, %63 in 1 : vector<16x767xbf16>, vector<16x1xbf16> -> vector<16x768xbf16>
    %65 = vector.extract_strided_slice %49 {offsets = [0, 17], sizes = [16, 751], strides = [1, 1]} : vector<16x768xbf16> to vector<16x751xbf16>
    %66 = vector.extract_strided_slice %49 {offsets = [0, 0], sizes = [16, 17], strides = [1, 1]} : vector<16x768xbf16> to vector<16x17xbf16>
    %67 = tpu.concatenate %65, %66 in 1 : vector<16x751xbf16>, vector<16x17xbf16> -> vector<16x768xbf16>
    %68 = vector.extract_strided_slice %49 {offsets = [0, 18], sizes = [16, 750], strides = [1, 1]} : vector<16x768xbf16> to vector<16x750xbf16>
    %69 = vector.extract_strided_slice %49 {offsets = [0, 0], sizes = [16, 18], strides = [1, 1]} : vector<16x768xbf16> to vector<16x18xbf16>
    %70 = tpu.concatenate %68, %69 in 1 : vector<16x750xbf16>, vector<16x18xbf16> -> vector<16x768xbf16>
    %71 = vector.extract_strided_slice %49 {offsets = [0, 19], sizes = [16, 749], strides = [1, 1]} : vector<16x768xbf16> to vector<16x749xbf16>
    %72 = vector.extract_strided_slice %49 {offsets = [0, 0], sizes = [16, 19], strides = [1, 1]} : vector<16x768xbf16> to vector<16x19xbf16>
    %73 = tpu.concatenate %71, %72 in 1 : vector<16x749xbf16>, vector<16x19xbf16> -> vector<16x768xbf16>
    %74 = tpu.concatenate %52, %55, %58, %61, %49, %64, %67, %70, %73 in 0 : vector<16x768xbf16>, vector<16x768xbf16>, vector<16x768xbf16>, vector<16x768xbf16>, vector<16x768xbf16>, vector<16x768xbf16>, vector<16x768xbf16>, vector<16x768xbf16>, vector<16x768xbf16> -> vector<144x768xbf16>
    %c0_14 = arith.constant 0 : index
    %c0_15 = arith.constant 0 : index
    %c0_16 = arith.constant 0 : index
    %75 = vector.load %arg3[%c0_14, %c0_15, %c0_16] : memref<1x16x144xbf16, #tpu.memory_space<vmem>>, vector<1x16x144xbf16>
    %76 = vector.shape_cast %75 : vector<1x16x144xbf16> to vector<16x144xbf16>
    %cst_17 = arith.constant dense<0.000000e+00> : vector<16x768xf32>
    %77 = tpu.matmul %76, %74, %cst_17 {dimension_numbers = #tpu.dot_dimension_numbers<[1], [0], [0], [1], [0, 0, 1, 1], [], []>} : vector<16x144xbf16>, vector<144x768xbf16>, vector<16x768xf32> -> vector<16x768xf32>
    %cst_18 = arith.constant dense<0.000000e+00> : vector<16x1xf32>
    %78 = tpu.matmul %77, %1, %cst_18 {dimension_numbers = #tpu.dot_dimension_numbers<[1], [0], [0], [1], [0, 0, 1, 1], [], []>} : vector<16x768xf32>, vector<768x1xf32>, vector<16x1xf32> -> vector<16x1xf32>
    %cst_19 = arith.constant 0.001953125 : f32
    %79 = vector.broadcast %cst_19 : f32 to vector<16x1xf32>
    %80 = arith.mulf %78, %79 : vector<16x1xf32>
    %81 = vector.broadcast %80 : vector<16x1xf32> to vector<16x768xf32>
    %82 = arith.subf %77, %81 : vector<16x768xf32>
    %83 = arith.mulf %82, %82 : vector<16x768xf32>
    %cst_20 = arith.constant dense<0.000000e+00> : vector<16x1xf32>
    %84 = tpu.matmul %83, %1, %cst_20 {dimension_numbers = #tpu.dot_dimension_numbers<[1], [0], [0], [1], [0, 0, 1, 1], [], []>} : vector<16x768xf32>, vector<768x1xf32>, vector<16x1xf32> -> vector<16x1xf32>
    %cst_21 = arith.constant 0.001953125 : f32
    %85 = vector.broadcast %cst_21 : f32 to vector<16x1xf32>
    %86 = arith.mulf %84, %85 : vector<16x1xf32>
    %cst_22 = arith.constant 9.99999974E-6 : f32
    %87 = vector.broadcast %cst_22 : f32 to vector<16x1xf32>
    %88 = arith.addf %86, %87 : vector<16x1xf32>
    %89 = math.rsqrt %88 : vector<16x1xf32>
    %90 = vector.broadcast %89 : vector<16x1xf32> to vector<16x768xf32>
    %91 = arith.mulf %82, %90 : vector<16x768xf32>
    %cst_23 = arith.constant 0.000000e+00 : f32
    %92 = vector.broadcast %cst_23 : f32 to vector<16x768xf32>
    %93 = arith.maximumf %91, %92 : vector<16x768xf32>
    %94 = arith.truncf %93 : vector<16x768xf32> to vector<16x768xbf16>
    %c0_24 = arith.constant 0 : index
    %c0_25 = arith.constant 0 : index
    %95 = vector.load %arg6[%c0_24, %c0_25] : memref<16x768xbf16, #tpu.memory_space<vmem>>, vector<16x768xbf16>
    tpu.vector_store %arg6[%c0_24, %c0_25], %94 {strides = array<i32>} : memref<16x768xbf16, #tpu.memory_space<vmem>>, vector<16x768xbf16>,
    return
  }
  func.func @transform_0(%arg0: i32) -> (i32, i32) {
    %c0_i32 = arith.constant 0 : i32
    %c0_i32_0 = arith.constant 0 : i32
    %c0_i32_1 = arith.constant 0 : i32
    return %c0_i32, %c0_i32_0 : i32, i32
  }
  func.func @transform_1(%arg0: i32) -> (i32, i32, i32) {
    %c0_i32 = arith.constant 0 : i32
    %c0_i32_0 = arith.constant 0 : i32
    %c0_i32_1 = arith.constant 0 : i32
    %c0_i32_2 = arith.constant 0 : i32
    return %c0_i32, %c0_i32_0, %c0_i32_1 : i32, i32, i32
  }
  func.func @transform_2(%arg0: i32) -> (i32, i32, i32) {
    %c0_i32 = arith.constant 0 : i32
    %c0_i32_0 = arith.constant 0 : i32
    %c0_i32_1 = arith.constant 0 : i32
    %c0_i32_2 = arith.constant 0 : i32
    return %c0_i32, %c0_i32_0, %c0_i32_1 : i32, i32, i32
  }
  func.func @transform_3(%arg0: i32) -> (i32, i32) {
    %c0_i32 = arith.constant 0 : i32
    %c0_i32_0 = arith.constant 0 : i32
    %c0_i32_1 = arith.constant 0 : i32
    return %c0_i32, %c0_i32_0 : i32, i32
  }
  func.func @transform_4(%arg0: i32) -> (i32, i32) {
    %c0_i32 = arith.constant 0 : i32
    %c0_i32_0 = arith.constant 0 : i32
    %c0_i32_1 = arith.constant 0 : i32
    return %c0_i32, %c0_i32_0 : i32, i32
  }
  func.func @transform_5(%arg0: i32) -> (i32, i32) {
    %c0_i32 = arith.constant 0 : i32
    %c0_i32_0 = arith.constant 0 : i32
    %c0_i32_1 = arith.constant 0 : i32
    return %c0_i32, %c0_i32_0 : i32, i32
  }
}

</mosaic_0001>

<bundles_post_ra>
// kernel: double_conv2d.1
= control target key start
LH: loop header
LB: loop body
LE: loop exit
PB: predicated region body
PF: predicated region fallthrough
CT: control target
= control target key end

     0   :  { %s2928_s22 = smov 19   ;;  %s2929_s25 = smov 18   ;;  %vm389_vm0 = vcmask 130048   ;;  %vm160_vm1 = vcmask 154624   ;;  %vm188_vm2 = vcmask 146432   ;;  %vm216_vm3 = vcmask 138240   ;;  %s4293_s0 = inlined_call_operand.vmem [shape: bf16[16,768], index: 0, kind: input, shape index: {}]   ;;  %s4294_s1 = inlined_call_operand.vmem [shape: bf16[1,16,144], index: 1, kind: input, shape index: {}]   ;;  %s4295_s4 = inlined_call_operand.vmem [shape: f32[768,1], index: 4, kind: input, shape index: {}]   ;;  %s4296_s3 = inlined_call_operand.vmem [shape: f32[1,768], index: 3, kind: input, shape index: {}]   ;;  %s4297_s2 = inlined_call_operand.vmem [shape: bf16[1,16,144], index: 2, kind: input, shape index: {}]   ;;  %s4298_s5 = inlined_call_operand.vmem [shape: bf16[16,768], index: 5, kind: output, shape index: {}]  }
   0x1   :  { %v2970_v0 = vld [vmem:[%s4293_s0 + $0x14] ss:$24 sps:$4 sm:$0xff]   ;;  %v2975_v1 = vld [vmem:[%s4293_s0] ss:$24 sps:$4 sm:$0xff]   ;;  %v2984_v2 = vld [vmem:[%s4293_s0 + $0x4] ss:$24 sps:$4 sm:$0xff]  }
   0x2   :  { %129 = vrot.lane.b32.xlu1 %v2970_v0, %s2928_s22  ;;  %150 = vrot.lane.b32.xlu0 %v2975_v1, %s2928_s22  ;;  %s2930_s26 = smov 17   ;;  %s2931_s27 = smov 1   ;;  %v3007_v3 = vld [vmem:[%s4293_s0 + $0x8] ss:$24 sps:$4 sm:$0xff]   ;;  %v3030_v4 = vld [vmem:[%s4294_s1 + $0x4] ss:$8 sps:$4 sm:$0xff]  }
   0x3   :  { %s2932_s30 = smov 127   ;;  %s2933_s6 = smov 111   ;;  %2034 = vmatprep.mubr.msk.bf16.mxu0 %vm389_vm0, %v3030_v4  ;;  %2035 = vmatprep.mubr.msk.bf16.mxu1 %vm389_vm0, %v3030_v4  ;;  %v3045_v5 = vld [vmem:[%s4293_s0 + $0xc] ss:$24 sps:$4 sm:$0xff]   ;;  %v3056_v6 = vld [vmem:[%s4293_s0 + $0x10] ss:$24 sps:$4 sm:$0xff]  }
   0x4   :  { %s2934_s7 = smov 110   ;;  %s2935_s10 = smov 109   ;;  %vm244_vm4 = vcmask 7168   ;;  %vm272_vm5 = vcmask 1039360   ;;  %vm300_vm6 = vcmask 908288   ;;  %vm328_vm7 = vcmask 900096  }
   0x5   :  { %vm356_vm8 = vcmask 891904   ;;  %v3171_v47 = vld [vmem:[%s4294_s1] ss:$8 sps:$4 sm:$0xff]  }
   0x6   :  { %178 = vrot.lane.b32.xlu1 %v2975_v1, %s2929_s25  ;;  %152 = vrot.lane.b32.xlu0 %v2984_v2, %s2928_s22 }
   0xa   :  { %176 = vrot.lane.b32.xlu1 %v2970_v0, %s2929_s25  ;;  %180 = vrot.lane.b32.xlu0 %v2984_v2, %s2929_s25 }
   0xe   :  { %208 = vrot.lane.b32.xlu1 %v2984_v2, %s2930_s26  ;;  %206 = vrot.lane.b32.xlu0 %v2975_v1, %s2930_s26 }
  0x12   :  { %234 = vrot.lane.b32.xlu1 %v2975_v1, %s2931_s27  ;;  %204 = vrot.lane.b32.xlu0 %v2970_v0, %s2930_s26 }
  0x16   :  { %232 = vrot.lane.b32.xlu1 %v2970_v0, %s2931_s27  ;;  %236 = vrot.lane.b32.xlu0 %v2984_v2, %s2931_s27 }
  0x1a   :  { %264 = vrot.lane.b32.xlu1 %v3007_v3, %s2932_s30  ;;  %262 = vrot.lane.b32.xlu0 %v2984_v2, %s2932_s30 }
  0x1e   :  { %290 = vrot.lane.b32.xlu1 %v2984_v2, %s2933_s6  ;;  %260 = vrot.lane.b32.xlu0 %v2975_v1, %s2932_s30 }
  0x22   :  { %288 = vrot.lane.b32.xlu1 %v2975_v1, %s2933_s6  ;;  %292 = vrot.lane.b32.xlu0 %v3007_v3, %s2933_s6 }
  0x26   :  { %320 = vrot.lane.b32.xlu1 %v3007_v3, %s2934_s7  ;;  %318 = vrot.lane.b32.xlu0 %v2984_v2, %s2934_s7 }
  0x2a   :  { %346 = vrot.lane.b32.xlu1 %v2984_v2, %s2935_s10  ;;  %316 = vrot.lane.b32.xlu0 %v2975_v1, %s2934_s7 }
  0x2e   :  { %344 = vrot.lane.b32.xlu1 %v2975_v1, %s2935_s10  ;;  %348 = vrot.lane.b32.xlu0 %v3007_v3, %s2935_s10 }
  0x32   :  { %156 = vrot.lane.b32.xlu1 %v3045_v5, %s2928_s22  ;;  %154 = vrot.lane.b32.xlu0 %v3007_v3, %s2928_s22 }
  0x36   :  { %182 = vrot.lane.b32.xlu1 %v3007_v3, %s2929_s25  ;;  %158 = vrot.lane.b32.xlu0 %v3056_v6, %s2928_s22 }
  0x3a   :  { %186 = vrot.lane.b32.xlu1 %v3056_v6, %s2929_s25  ;;  %184 = vrot.lane.b32.xlu0 %v3045_v5, %s2929_s25 }
  0x3e   :  { %212 = vrot.lane.b32.xlu1 %v3045_v5, %s2930_s26  ;;  %210 = vrot.lane.b32.xlu0 %v3007_v3, %s2930_s26 }
  0x42   :  { %238 = vrot.lane.b32.xlu1 %v3007_v3, %s2931_s27  ;;  %214 = vrot.lane.b32.xlu0 %v3056_v6, %s2930_s26 }
  0x46   :  { %242 = vrot.lane.b32.xlu1 %v3056_v6, %s2931_s27  ;;  %240 = vrot.lane.b32.xlu0 %v3045_v5, %s2931_s27 }
  0x4a   :  { %268 = vrot.lane.b32.xlu1 %v3056_v6, %s2932_s30  ;;  %266 = vrot.lane.b32.xlu0 %v3045_v5, %s2932_s30 }
  0x4e   :  { %294 = vrot.lane.b32.xlu1 %v3045_v5, %s2933_s6  ;;  %270 = vrot.lane.b32.xlu0 %v2970_v0, %s2932_s30 }
  0x52   :  { %298 = vrot.lane.b32.xlu1 %v2970_v0, %s2933_s6  ;;  %296 = vrot.lane.b32.xlu0 %v3056_v6, %s2933_s6 }
  0x56   :  { %324 = vrot.lane.b32.xlu1 %v3056_v6, %s2934_s7  ;;  %322 = vrot.lane.b32.xlu0 %v3045_v5, %s2934_s7 }
  0x5a   :  { %350 = vrot.lane.b32.xlu1 %v3045_v5, %s2935_s10  ;;  %326 = vrot.lane.b32.xlu0 %v2970_v0, %s2934_s7 }
  0x5e   :  { %354 = vrot.lane.b32.xlu1 %v2970_v0, %s2935_s10  ;;  %352 = vrot.lane.b32.xlu0 %v3056_v6, %s2935_s10 }
  0x74   :  { %v3102_v7 = vpop.permute.xlu1 %129  ;;  %v151_v8 = vpop.permute.xlu0 %150 }
  0x75   :  { %v174_v12 = vsel %vm160_vm1, %v3102_v7, %v151_v8 }
  0x78   :  { %v179_v9 = vpop.permute.xlu1 %178  ;;  %v3104_v10 = vpop.permute.xlu0 %152 }
  0x79   :  { %v161_v11 = vsel %vm160_vm1, %v151_v8, %v3104_v10 }
  0x7a   :  { %393 = vmatprep.subr.bf16.mxu0 %v161_v11 }
  0x7b   :  { %394 = vmatpush1.bf16.msra.mxu0 %v174_v12 }
  0x7c   :  { %v3110_v13 = vpop.permute.xlu1 %176  ;;  %v3112_v14 = vpop.permute.xlu0 %180 }
  0x7d   :  { %v202_v15 = vsel %vm188_vm2, %v3110_v13, %v179_v9  ;;  %v189_v16 = vsel %vm188_vm2, %v179_v9, %v3112_v14 }
  0x7e   :  { %395 = vmatprep.subr.bf16.mxu0 %v189_v16 }
  0x7f   :  { %396 = vmatpush1.bf16.msra.mxu0 %v202_v15 }
  0x80   :  { %v3118_v17 = vpop.permute.xlu1 %208  ;;  %v207_v18 = vpop.permute.xlu0 %206 }
  0x81   :  { %v217_v19 = vsel %vm216_vm3, %v207_v18, %v3118_v17 }
  0x82   :  { %397 = vmatprep.subr.bf16.mxu0 %v217_v19 }
  0x84   :  { %v235_v20 = vpop.permute.xlu1 %234  ;;  %v3122_v21 = vpop.permute.xlu0 %204 }
  0x85   :  { %v230_v22 = vsel %vm216_vm3, %v3122_v21, %v207_v18 }
  0x86   :  { %398 = vmatpush1.bf16.msra.mxu0 %v230_v22 }
  0x88   :  { %v3126_v23 = vpop.permute.xlu1 %232  ;;  %v3128_v24 = vpop.permute.xlu0 %236 }
  0x89   :  { %v258_v25 = vsel %vm244_vm4, %v3126_v23, %v235_v20  ;;  %v245_v26 = vsel %vm244_vm4, %v235_v20, %v3128_v24 }
  0x8a   :  { %399 = vmatprep.subr.bf16.mxu0 %v245_v26 }
  0x8b   :  { %400 = vmatpush1.bf16.msra.mxu0 %v258_v25 }
  0x8c   :  { %v3134_v27 = vpop.permute.xlu1 %264  ;;  %v263_v28 = vpop.permute.xlu0 %262  ;;  %401 = vmatprep.subr.bf16.mxu0 %v2984_v2 }
  0x8d   :  { %v274_v30 = vsel %vm272_vm5, %v263_v28, %v3134_v27 }
  0x8f   :  { %402 = vmatpush1.bf16.msra.mxu0 %v2975_v1 }
  0x90   :  { %v291_v29 = vpop.permute.xlu1 %290  ;;  %403 = vmatprep.subr.bf16.mxu0 %v274_v30  ;;  %v3140_v31 = vpop.permute.xlu0 %260 }
  0x91   :  { %v273_v32 = vsel %vm272_vm5, %v3140_v31, %v263_v28 }
  0x93   :  { %404 = vmatpush1.bf16.msra.mxu0 %v273_v32 }
  0x94   :  { %v3144_v33 = vpop.permute.xlu1 %288  ;;  %v3146_v34 = vpop.permute.xlu0 %292 }
  0x95   :  { %v301_v35 = vsel %vm300_vm6, %v3144_v33, %v291_v29  ;;  %v302_v36 = vsel %vm300_vm6, %v291_v29, %v3146_v34 }
  0x96   :  { %405 = vmatprep.subr.bf16.mxu0 %v302_v36 }
  0x97   :  { %406 = vmatpush1.bf16.msra.mxu0 %v301_v35  ;;  %v39_v35 = vld [vmem:[%s4295_s4 + $0x88] sm:$0xff] }
  0x98   :  { %v3152_v37 = vpop.permute.xlu1 %320  ;;  %v319_v38 = vpop.permute.xlu0 %318 }
  0x99   :  { %v330_v39 = vsel %vm328_vm7, %v319_v38, %v3152_v37 }
  0x9a   :  { %407 = vmatprep.subr.bf16.mxu0 %v330_v39 }
  0x9c   :  { %v347_v40 = vpop.permute.xlu1 %346  ;;  %v3156_v41 = vpop.permute.xlu0 %316 }
  0x9d   :  { %v329_v42 = vsel %vm328_vm7, %v3156_v41, %v319_v38 }
  0x9e   :  { %408 = vmatpush1.bf16.msra.mxu0 %v329_v42 }
  0xa0   :  { %v3160_v43 = vpop.permute.xlu1 %344  ;;  %v3162_v44 = vpop.permute.xlu0 %348 }
  0xa1   :  { %v357_v45 = vsel %vm356_vm8, %v3160_v43, %v347_v40  ;;  %v358_v46 = vsel %vm356_vm8, %v347_v40, %v3162_v44  ;;  %v22_v40 = vld [vmem:[%s4295_s4] sm:$0xff] }
  0xa2   :  { %409 = vmatprep.subr.bf16.mxu0 %v358_v46  ;;  %v40_v46 = vld [vmem:[%s4295_s4 + $0x90] sm:$0xff] }
  0xa3   :  { %410 = vmatpush1.bf16.msra.mxu0 %v357_v45 }
  0xa4   :  { %v157_v48 = vpop.permute.xlu1 %156  ;;  %v155_v49 = vpop.permute.xlu0 %154 }
  0xa5   :  { %v163_v50 = vsel %vm160_vm1, %v155_v49, %v157_v48  ;;  %v162_v51 = vsel %vm160_vm1, %v3104_v10, %v155_v49 }
  0xa6   :  { %436 = vmatprep.subr.bf16.mxu1 %v163_v50  ;;  %426 = vmatmul.mubr.bf16.vlgmr.msra.gmra.mrb[0].mxu0 %v3171_v47 }
  0xa7   :  { %437 = vmatpush1.bf16.msra.mxu1 %v162_v51  ;;  %2036 = vmatprep.mubr.msk.bf16.mxu0 %vm389_vm0, %v3030_v4  ;;  %v24_v51 = vld [vmem:[%s4295_s4 + $0x10] sm:$0xff] }
  0xa8   :  { %v183_v52 = vpop.permute.xlu1 %182  ;;  %v159_v53 = vpop.permute.xlu0 %158 }
  0xa9   :  { %v164_v54 = vsel %vm160_vm1, %v157_v48, %v159_v53  ;;  %v165_v55 = vsel %vm160_vm1, %v159_v53, %v3102_v7  ;;  %v190_v61 = vsel %vm188_vm2, %v3112_v14, %v183_v52  ;;  %v43_v53 = vld [vmem:[%s4295_s4 + $0xa8] sm:$0xff] }
  0xaa   :  { %479 = vmatprep.subr.bf16.mxu0 %v165_v55 }
  0xab   :  { %480 = vmatpush1.bf16.msra.mxu0 %v164_v54 }
  0xac   :  { %v187_v56 = vpop.permute.xlu1 %186  ;;  %v185_v57 = vpop.permute.xlu0 %184 }
  0xad   :  { %v193_v58 = vsel %vm188_vm2, %v187_v56, %v3110_v13  ;;  %v192_v59 = vsel %vm188_vm2, %v185_v57, %v187_v56  ;;  %v191_v60 = vsel %vm188_vm2, %v183_v52, %v185_v57  ;;  %v25_v52 = vld [vmem:[%s4295_s4 + $0x18] sm:$0xff]  ;;  %v26_v56 = vld [vmem:[%s4295_s4 + $0x20] sm:$0xff]  ;;  %v27_v57 = vld [vmem:[%s4295_s4 + $0x28] sm:$0xff] }
  0xae   :  { %481 = vmatprep.subr.bf16.mxu0 %v193_v58  ;;  %438 = vmatprep.subr.bf16.mxu1 %v191_v60  ;;  %v3268_v54 = vpack.c.bf16 %v25_v52, %v24_v51  ;;  %v45_v58 = vld [vmem:[%s4295_s4 + $0xb8] sm:$0xff] }
  0xaf   :  { %439 = vmatpush1.bf16.msra.mxu1 %v190_v61  ;;  %482 = vmatpush1.bf16.msra.mxu0 %v192_v59  ;;  %v3286_v59 = vpack.c.bf16 %v27_v57, %v26_v56  ;;  %v28_v61 = vld [vmem:[%s4295_s4 + $0x30] sm:$0xff]  ;;  %v109_v51 = vld [vmem:[%s4295_s4 + $0x2b8] sm:$0xff]  ;;  %v110_v56 = vld [vmem:[%s4295_s4 + $0x2c0] sm:$0xff] }
  0xb0   :  { %v213_v62 = vpop.permute.xlu1 %212  ;;  %v211_v63 = vpop.permute.xlu0 %210  ;;  %v111_v57 = vld [vmem:[%s4295_s4 + $0x2c8] sm:$0xff] }
  0xb1   :  { %v219_v1 = vsel %vm216_vm3, %v211_v63, %v213_v62  ;;  %v218_v2 = vsel %vm216_vm3, %v3118_v17, %v211_v63  ;;  %v46_v63 = vld [vmem:[%s4295_s4 + $0xc0] sm:$0xff] }
  0xb2   :  { %440 = vmatprep.subr.bf16.mxu1 %v219_v1  ;;  %v47_v1 = vld [vmem:[%s4295_s4 + $0xc8] sm:$0xff] }
  0xb3   :  { %441 = vmatpush1.bf16.msra.mxu1 %v218_v2 }
  0xb4   :  { %v239_v4 = vpop.permute.xlu1 %238  ;;  %v215_v7 = vpop.permute.xlu0 %214 }
  0xb5   :  { %v220_v8 = vsel %vm216_vm3, %v213_v62, %v215_v7  ;;  %v221_v9 = vsel %vm216_vm3, %v215_v7, %v3122_v21  ;;  %v246_v15 = vsel %vm244_vm4, %v3128_v24, %v239_v4  ;;  %v29_v62 = vld [vmem:[%s4295_s4 + $0x38] sm:$0xff]  ;;  %v30_v7 = vld [vmem:[%s4295_s4 + $0x40] sm:$0xff] }
  0xb6   :  { %483 = vmatprep.subr.bf16.mxu0 %v221_v9  ;;  %v3304_v2 = vpack.c.bf16 %v29_v62, %v28_v61  ;;  %v48_v9 = vld [vmem:[%s4295_s4 + $0xd0] sm:$0xff]  ;;  %v94_v61 = vld [vmem:[%s4295_s4 + $0x240] sm:$0xff]  ;;  %v95_v62 = vld [vmem:[%s4295_s4 + $0x248] sm:$0xff] }
  0xb7   :  { %484 = vmatpush1.bf16.msra.mxu0 %v220_v8  ;;  %v31_v8 = vld [vmem:[%s4295_s4 + $0x48] sm:$0xff] }
  0xb8   :  { %v243_v10 = vpop.permute.xlu1 %242  ;;  %v241_v11 = vpop.permute.xlu0 %240 }
  0xb9   :  { %v249_v12 = vsel %vm244_vm4, %v243_v10, %v3126_v23  ;;  %v248_v13 = vsel %vm244_vm4, %v241_v11, %v243_v10  ;;  %v247_v14 = vsel %vm244_vm4, %v239_v4, %v241_v11  ;;  %v3307_v4 = vpack.c.bf16 %v47_v1, %v46_v63  ;;  %v49_v10 = vld [vmem:[%s4295_s4 + $0xd8] sm:$0xff]  ;;  %v112_v63 = vld [vmem:[%s4295_s4 + $0x2d0] sm:$0xff] }
  0xba   :  { %485 = vmatprep.subr.bf16.mxu0 %v249_v12  ;;  %442 = vmatprep.subr.bf16.mxu1 %v247_v14  ;;  %v3322_v11 = vpack.c.bf16 %v31_v8, %v30_v7  ;;  %v3325_v12 = vpack.c.bf16 %v49_v10, %v48_v9  ;;  %v33_v14 = vld [vmem:[%s4295_s4 + $0x58] sm:$0xff]  ;;  %v3475_v7 = vpack.c.bf16 %v95_v62, %v94_v61  ;;  %v96_v9 = vld [vmem:[%s4295_s4 + $0x250] sm:$0xff]  ;;  %v59_v61 = vld [vmem:[%s4295_s4 + $0x128] sm:$0xff] }
  0xbb   :  { %443 = vmatpush1.bf16.msra.mxu1 %v246_v15  ;;  %486 = vmatpush1.bf16.msra.mxu0 %v248_v13  ;;  %4339 = vst [vmem:[#allocation2_spill] sm:$0xff] %v3307_v4  ;;  %v32_v13 = vld [vmem:[%s4295_s4 + $0x50] sm:$0xff]  ;;  %v50_v15 = vld [vmem:[%s4295_s4 + $0xe0] sm:$0xff]  ;;  %v113_v1 = vld [vmem:[%s4295_s4 + $0x2d8] sm:$0xff] }
  0xbc   :  { %v269_v16 = vpop.permute.xlu1 %268  ;;  %v267_v17 = vpop.permute.xlu0 %266  ;;  %444 = vmatprep.subr.bf16.mxu1 %v3045_v5  ;;  %487 = vmatprep.subr.bf16.mxu0 %v2970_v0  ;;  %4340 = vst [vmem:[#allocation3_spill] sm:$0xff] %v3322_v11  ;;  %4341 = vst [vmem:[#allocation4_spill] sm:$0xff] %v3325_v12  ;;  %v3478_v8 = vpack.c.bf16 %v113_v1, %v112_v63  ;;  %v97_v10 = vld [vmem:[%s4295_s4 + $0x258] sm:$0xff]  ;;  %v76_v62 = vld [vmem:[%s4295_s4 + $0x1b0] sm:$0xff] }
  0xbd   :  { %v276_v19 = vsel %vm272_vm5, %v267_v17, %v269_v16  ;;  %v275_v5 = vsel %vm272_vm5, %v3134_v27, %v267_v17  ;;  %v3340_v17 = vpack.c.bf16 %v33_v14, %v32_v13  ;;  %v114_v13 = vld [vmem:[%s4295_s4 + $0x2e0] sm:$0xff]  ;;  %v115_v14 = vld [vmem:[%s4295_s4 + $0x2e8] sm:$0xff]  ;;  %v77_v63 = vld [vmem:[%s4295_s4 + $0x1b8] sm:$0xff] }
  0xbf   :  { %445 = vmatpush1.bf16.msra.mxu1 %v3007_v3  ;;  %488 = vmatpush1.bf16.msra.mxu0 %v3056_v6  ;;  %4342 = vst [vmem:[#allocation5_spill] sm:$0xff] %v3340_v17 }
  0xc0   :  { %v295_v18 = vpop.permute.xlu1 %294  ;;  %446 = vmatprep.subr.bf16.mxu1 %v276_v19  ;;  %v271_v20 = vpop.permute.xlu0 %270  ;;  %v34_v19 = vld [vmem:[%s4295_s4 + $0x60] sm:$0xff] }
  0xc1   :  { %v277_v21 = vsel %vm272_vm5, %v269_v16, %v271_v20  ;;  %v286_v22 = vsel %vm272_vm5, %v271_v20, %v3140_v31  ;;  %v303_v25 = vsel %vm300_vm6, %v3146_v34, %v295_v18  ;;  %v38_v34 = vld [vmem:[%s4295_s4 + $0x80] sm:$0xff]  ;;  %v51_v16 = vld [vmem:[%s4295_s4 + $0xe8] sm:$0xff] }
  0xc2   :  { %489 = vmatprep.subr.bf16.mxu0 %v286_v22  ;;  %v3230_v39 = vpack.c.bf16 %v39_v35, %v38_v34  ;;  %v35_v20 = vld [vmem:[%s4295_s4 + $0x68] sm:$0xff]  ;;  %v53_v22 = vld [vmem:[%s4295_s4 + $0xf8] sm:$0xff] }
  0xc3   :  { %447 = vmatpush1.bf16.msra.mxu1 %v275_v5  ;;  %490 = vmatpush1.bf16.msra.mxu0 %v277_v21  ;;  %v52_v21 = vld [vmem:[%s4295_s4 + $0xf0] sm:$0xff]  ;;  %v3358_v5 = vpack.c.bf16 %v35_v20, %v34_v19  ;;  %v105_v34 = vld [vmem:[%s4295_s4 + $0x298] sm:$0xff]  ;;  %v98_v19 = vld [vmem:[%s4295_s4 + $0x260] sm:$0xff] }
  0xc4   :  { %v299_v0 = vpop.permute.xlu1 %298  ;;  %v297_v3 = vpop.permute.xlu0 %296  ;;  %v99_v20 = vld [vmem:[%s4295_s4 + $0x268] sm:$0xff] }
  0xc5   :  { %v314_v6 = vsel %vm300_vm6, %v299_v0, %v3144_v33  ;;  %v305_v23 = vsel %vm300_vm6, %v297_v3, %v299_v0  ;;  %v304_v24 = vsel %vm300_vm6, %v295_v18, %v297_v3  ;;  %v3343_v18 = vpack.c.bf16 %v51_v16, %v50_v15  ;;  %4344 = vst [vmem:[#allocation7_spill] sm:$0xff] %v3358_v5  ;;  %v36_v3 = vld [vmem:[%s4295_s4 + $0x70] sm:$0xff] }
  0xc6   :  { %491 = vmatprep.subr.bf16.mxu0 %v314_v6  ;;  %448 = vmatprep.subr.bf16.mxu1 %v304_v24  ;;  %v3361_v0 = vpack.c.bf16 %v53_v22, %v52_v21  ;;  %v37_v6 = vld [vmem:[%s4295_s4 + $0x78] sm:$0xff]  ;;  %v70_v24 = vld [vmem:[%s4295_s4 + $0x180] sm:$0xff]  ;;  %v3493_v15 = vpack.c.bf16 %v97_v10, %v96_v9  ;;  %v3496_v16 = vpack.c.bf16 %v115_v14, %v114_v13  ;;  %v116_v21 = vld [vmem:[%s4295_s4 + $0x2f0] sm:$0xff] }
  0xc7   :  { %449 = vmatpush1.bf16.msra.mxu1 %v303_v25  ;;  %492 = vmatpush1.bf16.msra.mxu0 %v305_v23  ;;  %4343 = vst [vmem:[#allocation6_spill] sm:$0xff] %v3343_v18  ;;  %v3371_v23 = vpack.c.bf16 %v37_v6, %v36_v3  ;;  %v71_v25 = vld [vmem:[%s4295_s4 + $0x188] sm:$0xff]  ;;  %v117_v22 = vld [vmem:[%s4295_s4 + $0x2f8] sm:$0xff]  ;;  %v3511_v3 = vpack.c.bf16 %v99_v20, %v98_v19  ;;  %v60_v10 = vld [vmem:[%s4295_s4 + $0x130] sm:$0xff] }
  0xc8   :  { %v325_v26 = vpop.permute.xlu1 %324  ;;  %v323_v27 = vpop.permute.xlu0 %322  ;;  %4345 = vst [vmem:[#allocation8_spill] sm:$0xff] %v3361_v0  ;;  %v3514_v6 = vpack.c.bf16 %v117_v22, %v116_v21  ;;  %v3590_v9 = vpack.c.bf16 %v77_v63, %v76_v62  ;;  %v61_v13 = vld [vmem:[%s4295_s4 + $0x138] sm:$0xff]  ;;  %v78_v14 = vld [vmem:[%s4295_s4 + $0x1c0] sm:$0xff]  ;;  %v79_v19 = vld [vmem:[%s4295_s4 + $0x1c8] sm:$0xff] }
  0xc9   :  { %v332_v28 = vsel %vm328_vm7, %v323_v27, %v325_v26  ;;  %v331_v29 = vsel %vm328_vm7, %v3152_v37, %v323_v27  ;;  %4346 = vst [vmem:[#allocation9_spill] sm:$0xff] %v3371_v23  ;;  %v3383_v27 = vpack.c.bf16 %v71_v25, %v70_v24  ;;  %v100_v24 = vld [vmem:[%s4295_s4 + $0x270] sm:$0xff]  ;;  %v101_v25 = vld [vmem:[%s4295_s4 + $0x278] sm:$0xff]  ;;  %v3605_v20 = vpack.c.bf16 %v61_v13, %v60_v10  ;;  %v62_v22 = vld [vmem:[%s4295_s4 + $0x140] sm:$0xff] }
  0xca   :  { %450 = vmatprep.subr.bf16.mxu1 %v332_v28  ;;  %v103_v28 = vld [vmem:[%s4295_s4 + $0x288] sm:$0xff]  ;;  %4348 = vst [vmem:[#allocation11_spill] sm:$0xff] %v3514_v6  ;;  %v3608_v21 = vpack.c.bf16 %v79_v19, %v78_v14  ;;  %v84_v63 = vld [vmem:[%s4295_s4 + $0x1f0] sm:$0xff]  ;;  %v85_v10 = vld [vmem:[%s4295_s4 + $0x1f8] sm:$0xff] }
  0xcb   :  { %451 = vmatpush1.bf16.msra.mxu1 %v331_v29  ;;  %4350 = vst [vmem:[#allocation13_spill] sm:$0xff] %v3605_v20  ;;  %v67_v62 = vld [vmem:[%s4295_s4 + $0x168] sm:$0xff]  ;;  %v3662_v14 = vpack.c.bf16 %v85_v10, %v84_v63  ;;  %v68_v19 = vld [vmem:[%s4295_s4 + $0x170] sm:$0xff]  ;;  %v2936_v63 = vmov 0  }
  0xcc   :  { %v351_v30 = vpop.permute.xlu1 %350  ;;  %v327_v31 = vpop.permute.xlu0 %326  ;;  %4351 = vst [vmem:[#allocation14_spill] sm:$0xff] %v3608_v21  ;;  %2903 = vset.pattern.permute.xlu0 %v2936_v63  ;;  %2904 = vset.pattern.permute.xlu1 %v2936_v63 }
  0xcd   :  { %v333_v32 = vsel %vm328_vm7, %v325_v26, %v327_v31  ;;  %v342_v33 = vsel %vm328_vm7, %v327_v31, %v3156_v41  ;;  %v23_v41 = vld [vmem:[%s4295_s4 + $0x8] sm:$0xff]  ;;  %v359_v48 = vsel %vm356_vm8, %v3162_v44, %v351_v30  ;;  %v42_v44 = vld [vmem:[%s4295_s4 + $0xa0] sm:$0xff]  ;;  %4357 = vst [vmem:[#allocation20_spill] sm:$0xff] %v3662_v14 }
  0xce   :  { %493 = vmatprep.subr.bf16.mxu0 %v342_v33  ;;  %v3248_v49 = vpack.c.bf16 %v23_v41, %v22_v40  ;;  %v3271_v55 = vpack.c.bf16 %v43_v53, %v42_v44  ;;  %v102_v26 = vld [vmem:[%s4295_s4 + $0x280] sm:$0xff]  ;;  %v87_v31 = vld [vmem:[%s4295_s4 + $0x208] sm:$0xff]  ;;  %v104_v33 = vld [vmem:[%s4295_s4 + $0x290] sm:$0xff] }
  0xcf   :  { %494 = vmatpush1.bf16.msra.mxu0 %v333_v32  ;;  %v3388_v29 = vpack.c.bf16 %v103_v28, %v102_v26  ;;  %v3406_v35 = vpack.c.bf16 %v105_v34, %v104_v33  ;;  %v106_v40 = vld [vmem:[%s4295_s4 + $0x2a0] sm:$0xff]  ;;  %v107_v41 = vld [vmem:[%s4295_s4 + $0x2a8] sm:$0xff]  ;;  %v92_v44 = vld [vmem:[%s4295_s4 + $0x230] sm:$0xff]  ;;  %v3524_v26 = vpack.c.bf16 %v101_v25, %v100_v24 }
  0xd0   :  { %v355_v36 = vpop.permute.xlu1 %354  ;;  %v353_v37 = vpop.permute.xlu0 %352  ;;  %v93_v53 = vld [vmem:[%s4295_s4 + $0x238] sm:$0xff]  ;;  %v54_v28 = vld [vmem:[%s4295_s4 + $0x100] sm:$0xff]  ;;  %v63_v24 = vld [vmem:[%s4295_s4 + $0x148] sm:$0xff] }
  0xd1   :  { %v370_v38 = vsel %vm356_vm8, %v355_v36, %v3160_v43  ;;  %v361_v42 = vsel %vm356_vm8, %v353_v37, %v355_v36  ;;  %v360_v45 = vsel %vm356_vm8, %v351_v30, %v353_v37  ;;  %v41_v43 = vld [vmem:[%s4295_s4 + $0x98] sm:$0xff]  ;;  %4347 = vst [vmem:[#allocation10_spill] sm:$0xff] %v3388_v29  ;;  %v86_v30 = vld [vmem:[%s4295_s4 + $0x200] sm:$0xff]  ;;  %v88_v36 = vld [vmem:[%s4295_s4 + $0x210] sm:$0xff] }
  0xd2   :  { %495 = vmatprep.subr.bf16.mxu0 %v370_v38  ;;  %452 = vmatprep.subr.bf16.mxu1 %v360_v45  ;;  %v3251_v50 = vpack.c.bf16 %v41_v43, %v40_v46  ;;  %v3397_v32 = vpack.c.bf16 %v87_v31, %v86_v30  ;;  %v89_v37 = vld [vmem:[%s4295_s4 + $0x218] sm:$0xff]  ;;  %v90_v45 = vld [vmem:[%s4295_s4 + $0x220] sm:$0xff]  ;;  %v91_v46 = vld [vmem:[%s4295_s4 + $0x228] sm:$0xff]  ;;  %4349 = vst [vmem:[#allocation12_spill] sm:$0xff] %v3524_v26 }
  0xd3   :  { %453 = vmatpush1.bf16.msra.mxu1 %v359_v48  ;;  %496 = vmatpush1.bf16.msra.mxu0 %v361_v42  ;;  %v3416_v38 = vpack.c.bf16 %v89_v37, %v88_v36  ;;  %v3424_v42 = vpack.c.bf16 %v107_v41, %v106_v40  ;;  %v108_v43 = vld [vmem:[%s4295_s4 + $0x2b0] sm:$0xff]  ;;  %v3436_v48 = vpack.c.bf16 %v91_v46, %v90_v45  ;;  %v55_v30 = vld [vmem:[%s4295_s4 + $0x108] sm:$0xff]  ;;  %v73_v33 = vld [vmem:[%s4295_s4 + $0x198] sm:$0xff] }
  0xd4   :  { %2511 = vmatprep.subr.bf16.mxu1 %v3230_v39  ;;  %2575 = vmatprep.subr.bf16.mxu0 %v3388_v29  ;;  %v3442_v52 = vpack.c.bf16 %v109_v51, %v108_v43  ;;  %v72_v31 = vld [vmem:[%s4295_s4 + $0x190] sm:$0xff]  ;;  %v3542_v36 = vpack.c.bf16 %v55_v30, %v54_v28  ;;  %v57_v45 = vld [vmem:[%s4295_s4 + $0x118] sm:$0xff]  ;;  %v74_v43 = vld [vmem:[%s4295_s4 + $0x1a0] sm:$0xff]  ;;  %v3623_v30 = vpack.c.bf16 %v63_v24, %v62_v22 }
  0xd5   :  { %v3546_v40 = vpack.c.bf16 %v73_v33, %v72_v31  ;;  %v56_v41 = vld [vmem:[%s4295_s4 + $0x110] sm:$0xff]  ;;  %v75_v51 = vld [vmem:[%s4295_s4 + $0x1a8] sm:$0xff]  ;;  %v81_v28 = vld [vmem:[%s4295_s4 + $0x1d8] sm:$0xff] }
  0xd6   :  { %469 = vmatmul.mubr.bf16.vlgmr.msra.gmra.mrb[0].mxu1 %v3171_v47  ;;  %512 = vmatmul.mubr.bf16.vlgmr.msra.gmra.mrb[4].mxu0 %v3171_v47  ;;  %v44_v47 = vld [vmem:[%s4295_s4 + $0xb0] sm:$0xff]  ;;  %4352 = vst [vmem:[#allocation15_spill] sm:$0xff] %v3623_v30  ;;  %v69_v22 = vld [vmem:[%s4295_s4 + $0x178] sm:$0xff] }
  0xd7   :  { %2513 = vmatpush3.bf16.msra.mxu1 %v3248_v49  ;;  %v3289_v60 = vpack.c.bf16 %v45_v58, %v44_v47  ;;  %2577 = vmatpush3.bf16.msra.mxu0 %v3397_v32  ;;  %v3457_v47 = vpack.c.bf16 %v93_v53, %v92_v44  ;;  %v3460_v58 = vpack.c.bf16 %v111_v57, %v110_v56  ;;  %v58_v57 = vld [vmem:[%s4295_s4 + $0x120] sm:$0xff]  ;;  %v80_v25 = vld [vmem:[%s4295_s4 + $0x1d0] sm:$0xff] }
  0xd8   :  { %2515 = vmatprep.subr.bf16.mxu1 %v3251_v50  ;;  %2579 = vmatprep.subr.bf16.mxu0 %v3406_v35  ;;  %v3568_v53 = vpack.c.bf16 %v57_v45, %v56_v41  ;;  %v3571_v56 = vpack.c.bf16 %v75_v51, %v74_v43  ;;  %v3587_v1 = vpack.c.bf16 %v59_v61, %v58_v57  ;;  %v64_v33 = vld [vmem:[%s4295_s4 + $0x150] sm:$0xff]  ;;  %v65_v41 = vld [vmem:[%s4295_s4 + $0x158] sm:$0xff]  ;;  %v82_v45 = vld [vmem:[%s4295_s4 + $0x1e0] sm:$0xff] }
  0xd9   :  { %v3626_v31 = vpack.c.bf16 %v81_v28, %v80_v25  ;;  %v83_v43 = vld [vmem:[%s4295_s4 + $0x1e8] sm:$0xff]  ;;  %v3641_v51 = vpack.c.bf16 %v65_v41, %v64_v33  ;;  %v66_v61 = vld [vmem:[%s4295_s4 + $0x160] sm:$0xff]  ;;  %v3671_v24 = vpack.c.bf16 %v69_v22, %v68_v19 }
  0xda   :  { %v3644_v57 = vpack.c.bf16 %v83_v43, %v82_v45  ;;  %v3659_v13 = vpack.c.bf16 %v67_v62, %v66_v61 }
  0xdb   :  { %2517 = vmatpush3.bf16.msra.mxu1 %v3268_v54  ;;  %2581 = vmatpush3.bf16.msra.mxu0 %v3416_v38  ;;  %4353 = vst [vmem:[#allocation16_spill] sm:$0xff] %v3626_v31  ;;  %4354 = vst [vmem:[#allocation17_spill] sm:$0xff] %v3641_v51 }
  0xdc   :  { %2519 = vmatprep.subr.bf16.mxu1 %v3271_v55  ;;  %2583 = vmatprep.subr.bf16.mxu0 %v3424_v42  ;;  %4355 = vst [vmem:[#allocation18_spill] sm:$0xff] %v3644_v57  ;;  %4356 = vst [vmem:[#allocation19_spill] sm:$0xff] %v3659_v13 }
  0xdd   :  { %4358 = vst [vmem:[#allocation21_spill] sm:$0xff] %v3671_v24 }
  0xdf   :  { %2521 = vmatpush3.bf16.msra.mxu1 %v3286_v59  ;;  %2585 = vmatpush3.bf16.msra.mxu0 %v3436_v48 }
  0xe0   :  { %2523 = vmatprep.subr.bf16.mxu1 %v3289_v60  ;;  %2587 = vmatprep.subr.bf16.mxu0 %v3442_v52 }
  0xe3   :  { %2525 = vmatpush3.bf16.msra.mxu1 %v3304_v2  ;;  %2589 = vmatpush3.bf16.msra.mxu0 %v3457_v47 }
  0xe4   :  { %2527 = vmatprep.subr.bf16.mxu1 %v3307_v4  ;;  %2591 = vmatprep.subr.bf16.mxu0 %v3460_v58 }
  0xe7   :  { %2529 = vmatpush3.bf16.msra.mxu1 %v3322_v11  ;;  %2593 = vmatpush3.bf16.msra.mxu0 %v3475_v7 }
  0xe8   :  { %2531 = vmatprep.subr.bf16.mxu1 %v3325_v12  ;;  %2595 = vmatprep.subr.bf16.mxu0 %v3478_v8 }
  0xeb   :  { %2533 = vmatpush3.bf16.msra.mxu1 %v3340_v17  ;;  %2597 = vmatpush3.bf16.msra.mxu0 %v3493_v15 }
  0xec   :  { %2535 = vmatprep.subr.bf16.mxu1 %v3343_v18  ;;  %2599 = vmatprep.subr.bf16.mxu0 %v3496_v16 }
  0xef   :  { %2537 = vmatpush3.bf16.msra.mxu1 %v3358_v5  ;;  %2601 = vmatpush3.bf16.msra.mxu0 %v3511_v3 }
  0xf0   :  { %2539 = vmatprep.subr.bf16.mxu1 %v3361_v0  ;;  %2603 = vmatprep.subr.bf16.mxu0 %v3514_v6 }
  0xf3   :  { %2541 = vmatpush3.bf16.msra.mxu1 %v3371_v23  ;;  %2605 = vmatpush3.bf16.msra.mxu0 %v3524_v26 }
  0xf4   :  { %2543 = vmatprep.subr.bf16.mxu1 %v3383_v27  ;;  %2639 = vmatprep.subr.bf16.mxu0 %v3383_v27 }
 0x179   :  { %v3540_v34 = vpop.f32.mrb[0].mxu0 }
 0x17a   :  { %v3544_v37 = vpop.f32.mrb[1].mxu0 }
 0x17b   :  { %586 = vmatprep.mubr.f32.mxu1 %v3544_v37  ;;  %v3555_v46 = vpop.f32.mrb[2].mxu0 }
 0x17c   :  { %587 = vmatmul.mubr.f32.vlgmr.msra.gmra.mrb[4].mxu1 %v3540_v34  ;;  %v3564_v44 = vpop.f32.mrb[3].mxu0 }
 0x17d   :  { %591 = vmatprep.mubr.f32.mxu1 %v3564_v44  ;;  %2545 = vmatpush3.bf16.msra.mxu1 %v3542_v36 }
 0x17e   :  { %2547 = vmatprep.subr.bf16.mxu1 %v3546_v40 }
 0x180   :  { %592 = vmatmul.mubr.f32.gmra.mrb[6].mxu1 %v3555_v46 }
 0x181   :  { %2549 = vmatpush3.bf16.msra.mxu1 %v3568_v53 }
 0x182   :  { %2551 = vmatprep.subr.bf16.mxu1 %v3571_v56 }
 0x185   :  { %2553 = vmatpush3.bf16.msra.mxu1 %v3587_v1 }
 0x186   :  { %2555 = vmatprep.subr.bf16.mxu1 %v3590_v9 }
 0x189   :  { %2557 = vmatpush3.bf16.msra.mxu1 %v3605_v20 }
 0x18a   :  { %2559 = vmatprep.subr.bf16.mxu1 %v3608_v21 }
 0x18d   :  { %2561 = vmatpush3.bf16.msra.mxu1 %v3623_v30 }
 0x18e   :  { %2563 = vmatprep.subr.bf16.mxu1 %v3626_v31 }
 0x191   :  { %2565 = vmatpush3.bf16.msra.mxu1 %v3641_v51 }
 0x192   :  { %2567 = vmatprep.subr.bf16.mxu1 %v3644_v57 }
 0x195   :  { %2569 = vmatpush3.bf16.msra.mxu1 %v3659_v13 }
 0x196   :  { %2571 = vmatprep.subr.bf16.mxu1 %v3662_v14 }
 0x199   :  { %2573 = vmatpush3.bf16.msra.mxu1 %v3671_v24 }
 0x19a   :  { %2607 = vmatprep.subr.bf16.mxu1 %v3230_v39 }
 0x1a9   :  { %v3676_v25 = vpop.f32.mrb[0].mxu1  ;;  %v3678_v28 = vpop.f32.mrb[4].mxu0 }
 0x1aa   :  { %v3680_v33 = vpop.f32.mrb[1].mxu1  ;;  %v3682_v41 = vpop.f32.mrb[5].mxu0 }
 0x1ab   :  { %v3684_v45 = vpop.f32.mrb[2].mxu1  ;;  %v3686_v43 = vpop.f32.mrb[6].mxu0  ;;  %661 = vmatprep.mubr.f32.mxu1 %v3680_v33  ;;  %736 = vmatprep.mubr.f32.mxu0 %v3682_v41 }
 0x1ac   :  { %v3690_v61 = vpop.f32.mrb[3].mxu1  ;;  %v3692_v62 = vpop.f32.mrb[7].mxu0  ;;  %662 = vmatmul.mubr.f32.vlgmr.msra.gmra.mrb[8].mxu1 %v3676_v25  ;;  %737 = vmatmul.mubr.f32.vlgmr.msra.gmra.mrb[8].mxu0 %v3678_v28 }
 0x1ad   :  { %666 = vmatprep.mubr.f32.mxu1 %v3690_v61  ;;  %741 = vmatprep.mubr.f32.mxu0 %v3692_v62 }
 0x1ae   :  { %2609 = vmatpush3.bf16.msra.mxu1 %v3248_v49  ;;  %2641 = vmatpush3.bf16.msra.mxu0 %v3542_v36 }
 0x1af   :  { %2611 = vmatprep.subr.bf16.mxu1 %v3251_v50  ;;  %2643 = vmatprep.subr.bf16.mxu0 %v3546_v40 }
 0x1b0   :  { %667 = vmatmul.mubr.f32.gmra.mrb[10].mxu1 %v3684_v45  ;;  %742 = vmatmul.mubr.f32.gmra.mrb[10].mxu0 %v3686_v43 }
 0x1b2   :  { %2613 = vmatpush3.bf16.msra.mxu1 %v3268_v54  ;;  %2645 = vmatpush3.bf16.msra.mxu0 %v3568_v53 }
 0x1b3   :  { %2615 = vmatprep.subr.bf16.mxu1 %v3271_v55  ;;  %2647 = vmatprep.subr.bf16.mxu0 %v3571_v56 }
 0x1b6   :  { %2617 = vmatpush3.bf16.msra.mxu1 %v3286_v59  ;;  %2649 = vmatpush3.bf16.msra.mxu0 %v3587_v1 }
 0x1b7   :  { %2619 = vmatprep.subr.bf16.mxu1 %v3289_v60  ;;  %2651 = vmatprep.subr.bf16.mxu0 %v3590_v9 }
 0x1ba   :  { %2621 = vmatpush3.bf16.msra.mxu1 %v3304_v2  ;;  %2653 = vmatpush3.bf16.msra.mxu0 %v3605_v20 }
 0x1bb   :  { %2623 = vmatprep.subr.bf16.mxu1 %v3307_v4  ;;  %2655 = vmatprep.subr.bf16.mxu0 %v3608_v21 }
 0x1be   :  { %2625 = vmatpush3.bf16.msra.mxu1 %v3322_v11  ;;  %2657 = vmatpush3.bf16.msra.mxu0 %v3623_v30 }
 0x1bf   :  { %2627 = vmatprep.subr.bf16.mxu1 %v3325_v12  ;;  %2659 = vmatprep.subr.bf16.mxu0 %v3626_v31 }
 0x1c2   :  { %2629 = vmatpush3.bf16.msra.mxu1 %v3340_v17  ;;  %2661 = vmatpush3.bf16.msra.mxu0 %v3641_v51 }
 0x1c3   :  { %2631 = vmatprep.subr.bf16.mxu1 %v3343_v18  ;;  %2663 = vmatprep.subr.bf16.mxu0 %v3644_v57 }
 0x1c6   :  { %2633 = vmatpush3.bf16.msra.mxu1 %v3358_v5  ;;  %2665 = vmatpush3.bf16.msra.mxu0 %v3659_v13 }
 0x1c7   :  { %2635 = vmatprep.subr.bf16.mxu1 %v3361_v0  ;;  %2667 = vmatprep.subr.bf16.mxu0 %v3662_v14 }
 0x1ca   :  { %2637 = vmatpush3.bf16.msra.mxu1 %v3371_v23  ;;  %2669 = vmatpush3.bf16.msra.mxu0 %v3671_v24 }
 0x1cb   :  { %2671 = vmatprep.subr.bf16.mxu1 %v3388_v29 }
 0x24f   :  { %v2086_v10 = vpop.f32.mrb[4].mxu1 }
 0x250   :  { %v2087_v19 = vpop.f32.mrb[5].mxu1 }
 0x251   :  { %v2088_v22 = vadd.f32 %v2087_v19, %v2086_v10 }
 0x253   :  { %v2089_v57 = vpop.f32.mrb[6].mxu1 }
 0x254   :  { %v2090_v5 = vpop.f32.mrb[7].mxu1 }
 0x255   :  { %v2091_v18 = vadd.f32 %v2090_v5, %v2089_v57 }
 0x27f   :  { %v2124_v13 = vpop.f32.mrb[8].mxu1  ;;  %v2162_v51 = vpop.f32.mrb[8].mxu0 }
 0x280   :  { %v2125_v0 = vpop.f32.mrb[9].mxu1  ;;  %v2163_v17 = vpop.f32.mrb[9].mxu0 }
 0x281   :  { %v2126_v14 = vadd.f32 %v2125_v0, %v2124_v13  ;;  %v2164_v31 = vadd.f32 %v2163_v17, %v2162_v51 }
 0x283   :  { %v664_v23 = vadd.f32 %v2126_v14, %v2088_v22  ;;  %v2127_v12 = vpop.f32.mrb[10].mxu1  ;;  %v2165_v24 = vpop.f32.mrb[10].mxu0 }
 0x284   :  { %v2128_v30 = vpop.f32.mrb[11].mxu1  ;;  %v2166_v29 = vpop.f32.mrb[11].mxu0 }
 0x285   :  { %v739_v11 = vadd.f32 %v2164_v31, %v664_v23  ;;  %v2129_v21 = vadd.f32 %v2128_v30, %v2127_v12  ;;  %v2167_v63 = vadd.f32 %v2166_v29, %v2165_v24 }
 0x287   :  { %v747_v4 = vmul.f32 0.001953125, %v739_v11  ;;  %v669_v20 = vadd.f32 %v2129_v21, %v2091_v18 }
 0x289   :  { %v744_v10 = vadd.f32 %v2167_v63, %v669_v20  ;;  %751 = vperm.xlu0 %2903, %v747_v4  }
 0x28b   :  { %v748_v19 = vmul.f32 0.001953125, %v744_v10 }
 0x28d   :  { %756 = vperm.xlu1 %2904, %v748_v19  }
 0x308   :  { %v752_v5 = vpop.permute.xlu0 %751 }
 0x309   :  { %v3732_v57 = vsub.f32 %v3540_v34, %v752_v5  ;;  %v3735_v17 = vsub.f32 %v3676_v25, %v752_v5  ;;  %v3738_v0 = vsub.f32 %v3544_v37, %v752_v5  ;;  %v3741_v23 = vsub.f32 %v3680_v33, %v752_v5 }
 0x30a   :  { %v3764_v30 = vsub.f32 %v3682_v41, %v752_v5  ;;  %v3790_v14 = vsub.f32 %v3678_v28, %v752_v5 }
 0x30b   :  { %v772_v11 = vmul.f32 %v3738_v0, %v3738_v0  ;;  %v771_v4 = vmul.f32 %v3732_v57, %v3732_v57  ;;  %v773_v12 = vmul.f32 %v3735_v17, %v3735_v17  ;;  %v774_v29 = vmul.f32 %v3741_v23, %v3741_v23 }
 0x30c   :  { %v757_v18 = vpop.permute.xlu1 %756  ;;  %v776_v13 = vmul.f32 %v3764_v30, %v3764_v30  ;;  %v775_v25 = vmul.f32 %v3790_v14, %v3790_v14 }
 0x30d   :  { %847 = vmatprep.mubr.f32.mxu1 %v772_v11  ;;  %v3752_v34 = vsub.f32 %v3564_v44, %v757_v18  ;;  %v3755_v37 = vsub.f32 %v3690_v61, %v757_v18  ;;  %v3758_v20 = vsub.f32 %v3555_v46, %v757_v18  ;;  %v3761_v21 = vsub.f32 %v3684_v45, %v757_v18 }
 0x30e   :  { %922 = vmatprep.mubr.f32.mxu0 %v774_v29  ;;  %848 = vmatmul.mubr.f32.vlgmr.msra.gmra.mrb[12].mxu1 %v771_v4  ;;  %v770_v24 = vsub.f32 %v3692_v62, %v757_v18  ;;  %v3798_v33 = vsub.f32 %v3686_v43, %v757_v18 }
 0x30f   :  { %923 = vmatmul.mubr.f32.vlgmr.msra.gmra.mrb[12].mxu0 %v773_v12  ;;  %2673 = vmatpush3.bf16.msra.mxu1 %v3397_v32  ;;  %v778_v44 = vmul.f32 %v3752_v34, %v3752_v34  ;;  %v780_v31 = vmul.f32 %v3755_v37, %v3755_v37  ;;  %v777_v46 = vmul.f32 %v3758_v20, %v3758_v20 }
 0x310   :  { %2675 = vmatprep.subr.bf16.mxu1 %v3406_v35  ;;  %v779_v51 = vmul.f32 %v3761_v21, %v3761_v21  ;;  %v782_v41 = vmul.f32 %v770_v24, %v770_v24  ;;  %v781_v45 = vmul.f32 %v3798_v33, %v3798_v33 }
 0x311   :  { %852 = vmatprep.mubr.f32.mxu1 %v778_v44  ;;  %927 = vmatprep.mubr.f32.mxu0 %v780_v31 }
 0x312   :  { %853 = vmatmul.mubr.f32.gmra.mrb[14].mxu1 %v777_v46 }
 0x313   :  { %928 = vmatmul.mubr.f32.gmra.mrb[14].mxu0 %v779_v51  ;;  %2677 = vmatpush3.bf16.msra.mxu1 %v3416_v38 }
 0x314   :  { %997 = vmatprep.mubr.f32.mxu1 %v776_v13  ;;  %2679 = vmatprep.subr.bf16.mxu1 %v3424_v42 }
 0x317   :  { %2681 = vmatpush3.bf16.msra.mxu1 %v3436_v48 }
 0x318   :  { %2683 = vmatprep.subr.bf16.mxu1 %v3442_v52 }
 0x31b   :  { %2685 = vmatpush3.bf16.msra.mxu1 %v3457_v47 }
 0x31c   :  { %2687 = vmatprep.subr.bf16.mxu1 %v3460_v58 }
 0x31f   :  { %2689 = vmatpush3.bf16.msra.mxu1 %v3475_v7 }
 0x320   :  { %2691 = vmatprep.subr.bf16.mxu1 %v3478_v8 }
 0x323   :  { %2693 = vmatpush3.bf16.msra.mxu1 %v3493_v15 }
 0x324   :  { %2695 = vmatprep.subr.bf16.mxu1 %v3496_v16 }
 0x327   :  { %2697 = vmatpush3.bf16.msra.mxu1 %v3511_v3 }
 0x328   :  { %2699 = vmatprep.subr.bf16.mxu1 %v3514_v6 }
 0x32b   :  { %2701 = vmatpush3.bf16.msra.mxu1 %v3524_v26 }
 0x32e   :  { %998 = vmatmul.mubr.f32.vlgmr.msra.gmra.mrb[16].mxu1 %v775_v25 }
 0x32f   :  { %1002 = vmatprep.mubr.f32.mxu1 %v782_v41 }
 0x332   :  { %1003 = vmatmul.mubr.f32.gmra.mrb[18].mxu1 %v781_v45 }
 0x3e1   :  { %v2200_v28 = vpop.f32.mrb[12].mxu1 }
 0x3e2   :  { %v2238_v61 = vpop.f32.mrb[12].mxu0  ;;  %v2201_v22 = vpop.f32.mrb[13].mxu1 }
 0x3e3   :  { %v2202_v63 = vadd.f32 %v2201_v22, %v2200_v28  ;;  %v2239_v62 = vpop.f32.mrb[13].mxu0 }
 0x3e4   :  { %v2240_v10 = vadd.f32 %v2239_v62, %v2238_v61 }
 0x3e5   :  { %v2203_v19 = vpop.f32.mrb[14].mxu1 }
 0x3e6   :  { %v925_v5 = vadd.f32 %v2240_v10, %v2202_v63  ;;  %v2241_v11 = vpop.f32.mrb[14].mxu0  ;;  %v2204_v4 = vpop.f32.mrb[15].mxu1  ;;  %v1049_v10 = vlaneseq }
 0x3e7   :  { %v2205_v12 = vadd.f32 %v2204_v4, %v2203_v19  ;;  %v2242_v43 = vpop.f32.mrb[15].mxu0 }
 0x3e8   :  { %v2243_v18 = vadd.f32 %v2242_v43, %v2241_v11  ;;  %v3802_v19 = vshrl.u32 %v1049_v10, 7 }
 0x3ea   :  { %v930_v29 = vadd.f32 %v2243_v18, %v2205_v12  ;;  %v1055_v4 = vsub.s32 1, %v3802_v19 }
 0x401   :  { %v2276_v44 = vpop.f32.mrb[16].mxu1 }
 0x402   :  { %v2277_v31 = vpop.f32.mrb[17].mxu1 }
 0x403   :  { %v2278_v46 = vadd.f32 %v2277_v31, %v2276_v44  ;;  %v1071_v31 = vsub.s32 5, %v3802_v19 }
 0x405   :  { %v1000_v51 = vadd.f32 %v2278_v46, %v925_v5  ;;  %v2279_v13 = vpop.f32.mrb[18].mxu1  ;;  %v1051_v5 = vsub.s32 0, %v3802_v19 }
 0x406   :  { %v2280_v25 = vpop.f32.mrb[19].mxu1 }
 0x407   :  { %v1008_v41 = vmul.f32 0.001953125, %v1000_v51  ;;  %v2281_v45 = vadd.f32 %v2280_v25, %v2279_v13 }
 0x409   :  { %v1010_v26 = vadd.f32 1e-05, %v1008_v41  ;;  %v1005_v28 = vadd.f32 %v2281_v45, %v930_v29 }
 0x40b   :  { %2920 = vrsqrt.f32 %v1010_v26  ;;  %v1009_v61 = vmul.f32 0.001953125, %v1005_v28  ;;  %v3811_v26 = vld [vmem:[%s4296_s3] sm:$0x3f] }
 0x40c   :  { %v1052_v29 = vrot.slane %v3811_v26, %v1051_v5  ;;  %v1056_v44 = vrot.slane %v3811_v26, %v1055_v4 }
 0x40d   :  { %v1011_v22 = vadd.f32 1e-05, %v1009_v61 }
 0x40f   :  { %2922 = vrsqrt.f32 %v1011_v22 }
 0x415   :  { %v2921_v63 = vpop.eup %2920 }
 0x416   :  { %1016 = vperm.xlu1 %2904, %v2921_v63  }
 0x419   :  { %v2923_v62 = vpop.eup %2922 }
 0x41a   :  { %1021 = vperm.xlu0 %2903, %v2923_v62  }
 0x495   :  { %v3804_v11 = vpop.permute.xlu1 %1016 }
 0x496   :  { %v1024_v12 = vmul.f32 %v3804_v11, %v3732_v57  ;;  %v1025_v43 = vmul.f32 %v3804_v11, %v3738_v0  ;;  %v1029_v46 = vmul.f32 %v3804_v11, %v3764_v30  ;;  %v1072_v0 = vrot.slane %v3811_v26, %v1071_v31 }
 0x498   :  { %v1036_v51 = vmax.f32 %v1024_v12, 0.0  ;;  %v1037_v13 = vmax.f32 %v1025_v43, 0.0  ;;  %v1041_v61 = vmax.f32 %v1029_v46, 0.0  ;;  %v1026_v43 = vmul.f32 %v3804_v11, %v3735_v17 }
 0x499   :  { %v1022_v18 = vpop.permute.xlu0 %1021 }
 0x49a   :  { %v1030_v25 = vmul.f32 %v1022_v18, %v3758_v20  ;;  %v1031_v41 = vmul.f32 %v1022_v18, %v3752_v34  ;;  %v1035_v57 = vmul.f32 %v1022_v18, %v770_v24  ;;  %v1079_v63 = vmul.f32 %v1052_v29, %v1036_v51 }
 0x49b   :  { %v1080_v62 = vmul.f32 %v1056_v44, %v1037_v13  ;;  %v1084_v12 = vmul.f32 %v1072_v0, %v1041_v61  ;;  %v1032_v20 = vmul.f32 %v1022_v18, %v3761_v21  ;;  %v1059_v24 = vsub.s32 2, %v3802_v19 }
 0x49c   :  { %v1042_v45 = vmax.f32 %v1030_v25, 0.0  ;;  %v1043_v28 = vmax.f32 %v1031_v41, 0.0  ;;  %v1047_v22 = vmax.f32 %v1035_v57, 0.0  ;;  %v1038_v31 = vmax.f32 %v1026_v43, 0.0 }
 0x49d   :  { %v1033_v51 = vmul.f32 %v1022_v18, %v3755_v37  ;;  %v1063_v13 = vsub.s32 3, %v3802_v19  ;;  %v1027_v25 = vmul.f32 %v3804_v11, %v3741_v23  ;;  %v1034_v41 = vmul.f32 %v1022_v18, %v3798_v33  ;;  %v3894_v23 = vld [vmem:[%s4297_s2 + $0x4] ss:$8 sps:$4 sm:$0xff]  }
 0x49e   :  { %v1085_v10 = vmul.f32 %v1052_v29, %v1042_v45  ;;  %v1086_v5 = vmul.f32 %v1056_v44, %v1043_v28  ;;  %v1090_v4 = vmul.f32 %v1072_v0, %v1047_v22  ;;  %v1044_v29 = vmax.f32 %v1032_v20, 0.0  ;;  %2039 = vmatprep.mubr.msk.bf16.mxu0 %vm389_vm0, %v3894_v23  ;;  %2040 = vmatprep.mubr.msk.bf16.mxu1 %vm389_vm0, %v3894_v23 }
 0x49f   :  { %v1060_v44 = vrot.slane %v3811_v26, %v1059_v24  ;;  %v1045_v57 = vmax.f32 %v1033_v51, 0.0  ;;  %v1064_v45 = vrot.slane %v3811_v26, %v1063_v13  ;;  %v1067_v28 = vsub.s32 4, %v3802_v19 }
 0x4a0   :  { %v3825_v6 = vpack.c.bf16 %v1085_v10, %v1079_v63  ;;  %v3827_v30 = vpack.c.bf16 %v1086_v5, %v1080_v62  ;;  %v3833_v34 = vpack.c.bf16 %v1090_v4, %v1084_v12  ;;  %v1028_v37 = vmul.f32 %v3804_v11, %v3790_v14 }
 0x4a1   :  { %v1087_v21 = vmul.f32 %v1060_v44, %v1044_v29  ;;  %v1081_v46 = vmul.f32 %v1060_v44, %v1038_v31  ;;  %v1039_v0 = vmax.f32 %v1027_v25, 0.0  ;;  %v1046_v33 = vmax.f32 %v1034_v41, 0.0 }
 0x4a2   :  { %1107 = vrot.lane.b32.xlu0 %v3827_v30, %s2928_s22  ;;  %1105 = vrot.lane.b32.xlu1 %v3825_v6, %s2928_s22  ;;  %v1088_v18 = vmul.f32 %v1064_v45, %v1045_v57  ;;  %v1068_v14 = vrot.slane %v3811_v26, %v1067_v28  ;;  %v1040_v19 = vmax.f32 %v1028_v37, 0.0 }
 0x4a3   :  { %v3860_v17 = vpack.c.bf16 %v1087_v21, %v1081_v46  ;;  %v1082_v11 = vmul.f32 %v1064_v45, %v1039_v0 }
 0x4a4   :  { %v1089_v61 = vmul.f32 %v1068_v14, %v1046_v33  ;;  %v1083_v63 = vmul.f32 %v1068_v14, %v1040_v19 }
 0x4a5   :  { %v3905_v22 = vpack.c.bf16 %v1088_v18, %v1082_v11 }
 0x4a6   :  { %1131 = vrot.lane.b32.xlu0 %v3825_v6, %s2929_s25  ;;  %1098 = vrot.lane.b32.xlu1 %v3833_v34, %s2928_s22  ;;  %v3911_v62 = vpack.c.bf16 %v1089_v61, %v1083_v63 }
 0x4aa   :  { %1129 = vrot.lane.b32.xlu0 %v3833_v34, %s2929_s25  ;;  %1133 = vrot.lane.b32.xlu1 %v3827_v30, %s2929_s25 }
 0x4ae   :  { %1159 = vrot.lane.b32.xlu0 %v3827_v30, %s2930_s26  ;;  %1157 = vrot.lane.b32.xlu1 %v3825_v6, %s2930_s26 }
 0x4b2   :  { %1183 = vrot.lane.b32.xlu0 %v3825_v6, %s2931_s27  ;;  %1155 = vrot.lane.b32.xlu1 %v3833_v34, %s2930_s26 }
 0x4b6   :  { %1181 = vrot.lane.b32.xlu0 %v3833_v34, %s2931_s27  ;;  %1185 = vrot.lane.b32.xlu1 %v3827_v30, %s2931_s27 }
 0x4ba   :  { %1211 = vrot.lane.b32.xlu0 %v3860_v17, %s2932_s30  ;;  %1209 = vrot.lane.b32.xlu1 %v3827_v30, %s2932_s30 }
 0x4be   :  { %1235 = vrot.lane.b32.xlu0 %v3827_v30, %s2933_s6  ;;  %1207 = vrot.lane.b32.xlu1 %v3825_v6, %s2932_s30 }
 0x4c2   :  { %1233 = vrot.lane.b32.xlu0 %v3825_v6, %s2933_s6  ;;  %1237 = vrot.lane.b32.xlu1 %v3860_v17, %s2933_s6 }
 0x4c6   :  { %1263 = vrot.lane.b32.xlu0 %v3860_v17, %s2934_s7  ;;  %1261 = vrot.lane.b32.xlu1 %v3827_v30, %s2934_s7 }
 0x4ca   :  { %1287 = vrot.lane.b32.xlu0 %v3827_v30, %s2935_s10  ;;  %1259 = vrot.lane.b32.xlu1 %v3825_v6, %s2934_s7 }
 0x4ce   :  { %1285 = vrot.lane.b32.xlu0 %v3825_v6, %s2935_s10  ;;  %1289 = vrot.lane.b32.xlu1 %v3860_v17, %s2935_s10 }
 0x4d2   :  { %1111 = vrot.lane.b32.xlu0 %v3905_v22, %s2928_s22  ;;  %1109 = vrot.lane.b32.xlu1 %v3860_v17, %s2928_s22 }
 0x4d6   :  { %1135 = vrot.lane.b32.xlu0 %v3860_v17, %s2929_s25  ;;  %1113 = vrot.lane.b32.xlu1 %v3911_v62, %s2928_s22 }
 0x4da   :  { %1139 = vrot.lane.b32.xlu0 %v3911_v62, %s2929_s25  ;;  %1137 = vrot.lane.b32.xlu1 %v3905_v22, %s2929_s25 }
 0x4de   :  { %1163 = vrot.lane.b32.xlu0 %v3905_v22, %s2930_s26  ;;  %1161 = vrot.lane.b32.xlu1 %v3860_v17, %s2930_s26 }
 0x4e2   :  { %1187 = vrot.lane.b32.xlu0 %v3860_v17, %s2931_s27  ;;  %1165 = vrot.lane.b32.xlu1 %v3911_v62, %s2930_s26 }
 0x4e6   :  { %1191 = vrot.lane.b32.xlu0 %v3911_v62, %s2931_s27  ;;  %1189 = vrot.lane.b32.xlu1 %v3905_v22, %s2931_s27 }
 0x4ea   :  { %1215 = vrot.lane.b32.xlu0 %v3911_v62, %s2932_s30  ;;  %1213 = vrot.lane.b32.xlu1 %v3905_v22, %s2932_s30 }
 0x4ee   :  { %1239 = vrot.lane.b32.xlu0 %v3905_v22, %s2933_s6  ;;  %1217 = vrot.lane.b32.xlu1 %v3833_v34, %s2932_s30 }
 0x4f2   :  { %1243 = vrot.lane.b32.xlu0 %v3833_v34, %s2933_s6  ;;  %1241 = vrot.lane.b32.xlu1 %v3911_v62, %s2933_s6 }
 0x4f6   :  { %1267 = vrot.lane.b32.xlu0 %v3911_v62, %s2934_s7  ;;  %1265 = vrot.lane.b32.xlu1 %v3905_v22, %s2934_s7 }
 0x4fa   :  { %1291 = vrot.lane.b32.xlu0 %v3905_v22, %s2935_s10  ;;  %1269 = vrot.lane.b32.xlu1 %v3833_v34, %s2934_s7 }
 0x4fe   :  { %1295 = vrot.lane.b32.xlu0 %v3833_v34, %s2935_s10  ;;  %1293 = vrot.lane.b32.xlu1 %v3911_v62, %s2935_s10 }
 0x514   :  { %v1108_v26 = vpop.permute.xlu0 %1107  ;;  %v1106_v10 = vpop.permute.xlu1 %1105 }
 0x515   :  { %v1115_v5 = vsel %vm160_vm1, %v1106_v10, %v1108_v26 }
 0x516   :  { %1325 = vmatprep.subr.bf16.mxu0 %v1115_v5 }
 0x518   :  { %v1132_v4 = vpop.permute.xlu0 %1131  ;;  %v3958_v12 = vpop.permute.xlu1 %1098 }
 0x519   :  { %v1127_v20 = vsel %vm160_vm1, %v3958_v12, %v1106_v10 }
 0x51a   :  { %1326 = vmatpush1.bf16.msra.mxu0 %v1127_v20 }
 0x51c   :  { %v3962_v24 = vpop.permute.xlu0 %1129  ;;  %v3964_v43 = vpop.permute.xlu1 %1133 }
 0x51d   :  { %v1153_v29 = vsel %vm188_vm2, %v3962_v24, %v1132_v4  ;;  %v1141_v44 = vsel %vm188_vm2, %v1132_v4, %v3964_v43 }
 0x51e   :  { %1327 = vmatprep.subr.bf16.mxu0 %v1141_v44 }
 0x51f   :  { %1328 = vmatpush1.bf16.msra.mxu0 %v1153_v29 }
 0x520   :  { %v3970_v31 = vpop.permute.xlu0 %1159  ;;  %v1158_v21 = vpop.permute.xlu1 %1157 }
 0x521   :  { %v1167_v46 = vsel %vm216_vm3, %v1158_v21, %v3970_v31 }
 0x522   :  { %1329 = vmatprep.subr.bf16.mxu0 %v1167_v46 }
 0x524   :  { %v1184_v51 = vpop.permute.xlu0 %1183  ;;  %v3974_v13 = vpop.permute.xlu1 %1155 }
 0x525   :  { %v1179_v25 = vsel %vm216_vm3, %v3974_v13, %v1158_v21 }
 0x526   :  { %1330 = vmatpush1.bf16.msra.mxu0 %v1179_v25  ;;  %v4023_v25 = vld [vmem:[%s4297_s2] ss:$8 sps:$4 sm:$0xff]  }
 0x528   :  { %v3978_v41 = vpop.permute.xlu0 %1181  ;;  %v3980_v57 = vpop.permute.xlu1 %1185 }
 0x529   :  { %v1205_v45 = vsel %vm244_vm4, %v3978_v41, %v1184_v51  ;;  %v1193_v28 = vsel %vm244_vm4, %v1184_v51, %v3980_v57 }
 0x52a   :  { %1331 = vmatprep.subr.bf16.mxu0 %v1193_v28 }
 0x52b   :  { %1332 = vmatpush1.bf16.msra.mxu0 %v1205_v45 }
 0x52c   :  { %v3986_v37 = vpop.permute.xlu0 %1211  ;;  %1333 = vmatprep.subr.bf16.mxu0 %v3827_v30  ;;  %v1210_v0 = vpop.permute.xlu1 %1209 }
 0x52d   :  { %v1220_v33 = vsel %vm272_vm5, %v1210_v0, %v3986_v37 }
 0x52f   :  { %1334 = vmatpush1.bf16.msra.mxu0 %v3825_v6 }
 0x530   :  { %v1236_v18 = vpop.permute.xlu0 %1235  ;;  %1335 = vmatprep.subr.bf16.mxu0 %v1220_v33  ;;  %v3992_v14 = vpop.permute.xlu1 %1207 }
 0x531   :  { %v1219_v19 = vsel %vm272_vm5, %v3992_v14, %v1210_v0 }
 0x533   :  { %1336 = vmatpush1.bf16.msra.mxu0 %v1219_v19 }
 0x534   :  { %v3996_v11 = vpop.permute.xlu0 %1233  ;;  %v3998_v61 = vpop.permute.xlu1 %1237 }
 0x535   :  { %v1245_v30 = vsel %vm300_vm6, %v3996_v11, %v1236_v18  ;;  %v1246_v6 = vsel %vm300_vm6, %v1236_v18, %v3998_v61 }
 0x536   :  { %1337 = vmatprep.subr.bf16.mxu0 %v1246_v6 }
 0x537   :  { %1338 = vmatpush1.bf16.msra.mxu0 %v1245_v30 }
 0x538   :  { %v4004_v63 = vpop.permute.xlu0 %1263  ;;  %v1262_v10 = vpop.permute.xlu1 %1261 }
 0x539   :  { %v1272_v5 = vsel %vm328_vm7, %v1262_v10, %v4004_v63 }
 0x53a   :  { %1339 = vmatprep.subr.bf16.mxu0 %v1272_v5 }
 0x53c   :  { %v1288_v4 = vpop.permute.xlu0 %1287  ;;  %v4008_v20 = vpop.permute.xlu1 %1259 }
 0x53d   :  { %v1271_v29 = vsel %vm328_vm7, %v4008_v20, %v1262_v10 }
 0x53e   :  { %1340 = vmatpush1.bf16.msra.mxu0 %v1271_v29 }
 0x540   :  { %v4012_v44 = vpop.permute.xlu0 %1285  ;;  %v4014_v21 = vpop.permute.xlu1 %1289 }
 0x541   :  { %v1297_v46 = vsel %vm356_vm8, %v4012_v44, %v1288_v4  ;;  %v1298_v51 = vsel %vm356_vm8, %v1288_v4, %v4014_v21 }
 0x542   :  { %1341 = vmatprep.subr.bf16.mxu0 %v1298_v51 }
 0x543   :  { %1342 = vmatpush1.bf16.msra.mxu0 %v1297_v46 }
 0x544   :  { %v1112_v45 = vpop.permute.xlu0 %1111  ;;  %v1110_v28 = vpop.permute.xlu1 %1109 }
 0x545   :  { %v1116_v0 = vsel %vm160_vm1, %v1108_v26, %v1110_v28  ;;  %v1117_v33 = vsel %vm160_vm1, %v1110_v28, %v1112_v45 }
 0x546   :  { %1368 = vmatprep.subr.bf16.mxu1 %v1117_v33  ;;  %1358 = vmatmul.mubr.bf16.vlgmr.msra.gmra.mrb[16].mxu0 %v4023_v25 }
 0x547   :  { %1369 = vmatpush1.bf16.msra.mxu1 %v1116_v0  ;;  %2041 = vmatprep.mubr.msk.bf16.mxu0 %vm389_vm0, %v3894_v23 }
 0x548   :  { %v1136_v18 = vpop.permute.xlu0 %1135  ;;  %v1114_v19 = vpop.permute.xlu1 %1113 }
 0x549   :  { %v1118_v30 = vsel %vm160_vm1, %v1112_v45, %v1114_v19  ;;  %v1119_v6 = vsel %vm160_vm1, %v1114_v19, %v3958_v12  ;;  %v1142_v23 = vsel %vm188_vm2, %v3964_v43, %v1136_v18 }
 0x54a   :  { %1411 = vmatprep.subr.bf16.mxu0 %v1119_v6 }
 0x54b   :  { %1412 = vmatpush1.bf16.msra.mxu0 %v1118_v30 }
 0x54c   :  { %v1140_v10 = vpop.permute.xlu0 %1139  ;;  %v1138_v26 = vpop.permute.xlu1 %1137 }
 0x54d   :  { %v1144_v5 = vsel %vm188_vm2, %v1138_v26, %v1140_v10  ;;  %v1143_v4 = vsel %vm188_vm2, %v1136_v18, %v1138_v26  ;;  %v1145_v29 = vsel %vm188_vm2, %v1140_v10, %v3962_v24 }
 0x54e   :  { %1370 = vmatprep.subr.bf16.mxu1 %v1143_v4  ;;  %1413 = vmatprep.subr.bf16.mxu0 %v1145_v29 }
 0x54f   :  { %1371 = vmatpush1.bf16.msra.mxu1 %v1142_v23  ;;  %1414 = vmatpush1.bf16.msra.mxu0 %v1144_v5 }
 0x550   :  { %v1164_v46 = vpop.permute.xlu0 %1163  ;;  %v1162_v12 = vpop.permute.xlu1 %1161 }
 0x551   :  { %v1168_v51 = vsel %vm216_vm3, %v3970_v31, %v1162_v12  ;;  %v1169_v45 = vsel %vm216_vm3, %v1162_v12, %v1164_v46 }
 0x552   :  { %1372 = vmatprep.subr.bf16.mxu1 %v1169_v45 }
 0x553   :  { %1373 = vmatpush1.bf16.msra.mxu1 %v1168_v51 }
 0x554   :  { %v1188_v28 = vpop.permute.xlu0 %1187  ;;  %v1166_v0 = vpop.permute.xlu1 %1165 }
 0x555   :  { %v1170_v24 = vsel %vm216_vm3, %v1164_v46, %v1166_v0  ;;  %v1171_v43 = vsel %vm216_vm3, %v1166_v0, %v3974_v13  ;;  %v1194_v6 = vsel %vm244_vm4, %v3980_v57, %v1188_v28 }
 0x556   :  { %1415 = vmatprep.subr.bf16.mxu0 %v1171_v43 }
 0x557   :  { %1416 = vmatpush1.bf16.msra.mxu0 %v1170_v24 }
 0x558   :  { %v1192_v33 = vpop.permute.xlu0 %1191  ;;  %v1190_v18 = vpop.permute.xlu1 %1189 }
 0x559   :  { %v1196_v19 = vsel %vm244_vm4, %v1190_v18, %v1192_v33  ;;  %v1195_v30 = vsel %vm244_vm4, %v1188_v28, %v1190_v18  ;;  %v1197_v31 = vsel %vm244_vm4, %v1192_v33, %v3978_v41 }
 0x55a   :  { %1374 = vmatprep.subr.bf16.mxu1 %v1195_v30  ;;  %1417 = vmatprep.subr.bf16.mxu0 %v1197_v31  ;;  %v4364_v30 = vld [vmem:[#allocation4_spill] sm:$0xff] }
 0x55b   :  { %1375 = vmatpush1.bf16.msra.mxu1 %v1194_v6  ;;  %1418 = vmatpush1.bf16.msra.mxu0 %v1196_v19  ;;  %v4363_v19 = vld [vmem:[#allocation15_spill] sm:$0xff]  ;;  %v4365_v31 = vld [vmem:[#allocation16_spill] sm:$0xff]  ;;  %v4366_v6 = vld [vmem:[#allocation5_spill] sm:$0xff] }
 0x55c   :  { %v1216_v10 = vpop.permute.xlu0 %1215  ;;  %1376 = vmatprep.subr.bf16.mxu1 %v3905_v22  ;;  %1419 = vmatprep.subr.bf16.mxu0 %v3833_v34  ;;  %v1214_v13 = vpop.permute.xlu1 %1213 }
 0x55d   :  { %v1222_v26 = vsel %vm272_vm5, %v1214_v13, %v1216_v10  ;;  %v1221_v22 = vsel %vm272_vm5, %v3986_v37, %v1214_v13  ;;  %v4368_v13 = vld [vmem:[#allocation6_spill] sm:$0xff] }
 0x55f   :  { %1377 = vmatpush1.bf16.msra.mxu1 %v3860_v17  ;;  %1420 = vmatpush1.bf16.msra.mxu0 %v3911_v62 }
 0x560   :  { %v1240_v41 = vpop.permute.xlu0 %1239  ;;  %1378 = vmatprep.subr.bf16.mxu1 %v1222_v26  ;;  %v1218_v5 = vpop.permute.xlu1 %1217  ;;  %v4369_v26 = vld [vmem:[#allocation18_spill] sm:$0xff] }
 0x561   :  { %v1223_v57 = vsel %vm272_vm5, %v1216_v10, %v1218_v5  ;;  %v1231_v4 = vsel %vm272_vm5, %v1218_v5, %v3992_v14  ;;  %v1247_v46 = vsel %vm300_vm6, %v3998_v61, %v1240_v41  ;;  %v4367_v10 = vld [vmem:[#allocation17_spill] sm:$0xff]  ;;  %v4371_v5 = vld [vmem:[#allocation19_spill] sm:$0xff] }
 0x562   :  { %1421 = vmatprep.subr.bf16.mxu0 %v1231_v4  ;;  %v4373_v4 = vld [vmem:[#allocation20_spill] sm:$0xff] }
 0x563   :  { %1379 = vmatpush1.bf16.msra.mxu1 %v1221_v22  ;;  %1422 = vmatpush1.bf16.msra.mxu0 %v1223_v57  ;;  %v4372_v57 = vld [vmem:[#allocation8_spill] sm:$0xff]  ;;  %v4374_v22 = vld [vmem:[#allocation9_spill] sm:$0xff] }
 0x564   :  { %v1244_v34 = vpop.permute.xlu0 %1243  ;;  %v1242_v17 = vpop.permute.xlu1 %1241 }
 0x565   :  { %v1249_v62 = vsel %vm300_vm6, %v1242_v17, %v1244_v34  ;;  %v1248_v29 = vsel %vm300_vm6, %v1240_v41, %v1242_v17  ;;  %v1257_v23 = vsel %vm300_vm6, %v1244_v34, %v3996_v11  ;;  %v4370_v41 = vld [vmem:[#allocation7_spill] sm:$0xff]  ;;  %v4375_v34 = vld [vmem:[#allocation21_spill] sm:$0xff]  ;;  %v4376_v17 = vld [vmem:[#allocation10_spill] sm:$0xff] }
 0x566   :  { %1380 = vmatprep.subr.bf16.mxu1 %v1248_v29  ;;  %1423 = vmatprep.subr.bf16.mxu0 %v1257_v23 }
 0x567   :  { %1381 = vmatpush1.bf16.msra.mxu1 %v1247_v46  ;;  %1424 = vmatpush1.bf16.msra.mxu0 %v1249_v62 }
 0x568   :  { %v1268_v37 = vpop.permute.xlu0 %1267  ;;  %v1266_v14 = vpop.permute.xlu1 %1265 }
 0x569   :  { %v1273_v12 = vsel %vm328_vm7, %v4004_v63, %v1266_v14  ;;  %v1274_v51 = vsel %vm328_vm7, %v1266_v14, %v1268_v37 }
 0x56a   :  { %1382 = vmatprep.subr.bf16.mxu1 %v1274_v51 }
 0x56b   :  { %1383 = vmatpush1.bf16.msra.mxu1 %v1273_v12 }
 0x56c   :  { %v1292_v45 = vpop.permute.xlu0 %1291  ;;  %v1270_v28 = vpop.permute.xlu1 %1269 }
 0x56d   :  { %v1275_v11 = vsel %vm328_vm7, %v1268_v37, %v1270_v28  ;;  %v1283_v61 = vsel %vm328_vm7, %v1270_v28, %v4008_v20  ;;  %v1299_v18 = vsel %vm356_vm8, %v4014_v21, %v1292_v45  ;;  %v4359_v20 = vld [vmem:[#allocation13_spill] sm:$0xff]  ;;  %v4361_v21 = vld [vmem:[#allocation14_spill] sm:$0xff]  ;;  %v4378_v37 = vld [vmem:[#allocation12_spill] sm:$0xff] }
 0x56e   :  { %1425 = vmatprep.subr.bf16.mxu0 %v1283_v61 }
 0x56f   :  { %1426 = vmatpush1.bf16.msra.mxu0 %v1275_v11 }
 0x570   :  { %v1296_v0 = vpop.permute.xlu0 %1295  ;;  %v1294_v24 = vpop.permute.xlu1 %1293 }
 0x571   :  { %v1301_v43 = vsel %vm356_vm8, %v1294_v24, %v1296_v0  ;;  %v1300_v33 = vsel %vm356_vm8, %v1292_v45, %v1294_v24  ;;  %v1309_v63 = vsel %vm356_vm8, %v1296_v0, %v4012_v44  ;;  %v4360_v44 = vld [vmem:[#allocation2_spill] sm:$0xff] }
 0x572   :  { %1384 = vmatprep.subr.bf16.mxu1 %v1300_v33  ;;  %1427 = vmatprep.subr.bf16.mxu0 %v1309_v63 }
 0x573   :  { %1385 = vmatpush1.bf16.msra.mxu1 %v1299_v18  ;;  %1428 = vmatpush1.bf16.msra.mxu0 %v1301_v43 }
 0x574   :  { %2703 = vmatprep.subr.bf16.mxu1 %v3230_v39  ;;  %2735 = vmatprep.subr.bf16.mxu0 %v3383_v27 }
 0x576   :  { %1401 = vmatmul.mubr.bf16.vlgmr.msra.gmra.mrb[20].mxu1 %v4023_v25  ;;  %1444 = vmatmul.mubr.bf16.vlgmr.msra.gmra.mrb[20].mxu0 %v4023_v25  ;;  %v4362_v25 = vld [vmem:[#allocation3_spill] sm:$0xff] }
 0x577   :  { %2705 = vmatpush3.bf16.msra.mxu1 %v3248_v49  ;;  %2737 = vmatpush3.bf16.msra.mxu0 %v3542_v36 }
 0x578   :  { %2707 = vmatprep.subr.bf16.mxu1 %v3251_v50  ;;  %2739 = vmatprep.subr.bf16.mxu0 %v3546_v40 }
 0x57b   :  { %2709 = vmatpush3.bf16.msra.mxu1 %v3268_v54  ;;  %2741 = vmatpush3.bf16.msra.mxu0 %v3568_v53 }
 0x57c   :  { %2711 = vmatprep.subr.bf16.mxu1 %v3271_v55  ;;  %2743 = vmatprep.subr.bf16.mxu0 %v3571_v56 }
 0x57f   :  { %2713 = vmatpush3.bf16.msra.mxu1 %v3286_v59  ;;  %2745 = vmatpush3.bf16.msra.mxu0 %v3587_v1 }
 0x580   :  { %2715 = vmatprep.subr.bf16.mxu1 %v3289_v60  ;;  %2747 = vmatprep.subr.bf16.mxu0 %v3590_v9 }
 0x583   :  { %2717 = vmatpush3.bf16.msra.mxu1 %v3304_v2  ;;  %2749 = vmatpush3.bf16.msra.mxu0 %v4359_v20 }
 0x584   :  { %2719 = vmatprep.subr.bf16.mxu1 %v4360_v44  ;;  %2751 = vmatprep.subr.bf16.mxu0 %v4361_v21 }
 0x587   :  { %2721 = vmatpush3.bf16.msra.mxu1 %v4362_v25  ;;  %2753 = vmatpush3.bf16.msra.mxu0 %v4363_v19 }
 0x588   :  { %2723 = vmatprep.subr.bf16.mxu1 %v4364_v30  ;;  %2755 = vmatprep.subr.bf16.mxu0 %v4365_v31 }
 0x58b   :  { %2725 = vmatpush3.bf16.msra.mxu1 %v4366_v6  ;;  %2757 = vmatpush3.bf16.msra.mxu0 %v4367_v10 }
 0x58c   :  { %2727 = vmatprep.subr.bf16.mxu1 %v4368_v13  ;;  %2759 = vmatprep.subr.bf16.mxu0 %v4369_v26 }
 0x58f   :  { %2729 = vmatpush3.bf16.msra.mxu1 %v4370_v41  ;;  %2761 = vmatpush3.bf16.msra.mxu0 %v4371_v5 }
 0x590   :  { %2731 = vmatprep.subr.bf16.mxu1 %v4372_v57  ;;  %2763 = vmatprep.subr.bf16.mxu0 %v4373_v4 }
 0x593   :  { %2733 = vmatpush3.bf16.msra.mxu1 %v4374_v22  ;;  %2765 = vmatpush3.bf16.msra.mxu0 %v4375_v34 }
 0x594   :  { %2767 = vmatprep.subr.bf16.mxu1 %v4376_v17  ;;  %2799 = vmatprep.subr.bf16.mxu0 %v3230_v39  ;;  %v4377_v39 = vld [vmem:[#allocation11_spill] sm:$0xff] }
 0x619   :  { %v4115_v62 = vpop.f32.mrb[16].mxu0 }
 0x61a   :  { %v4117_v29 = vpop.f32.mrb[17].mxu0 }
 0x61b   :  { %1518 = vmatprep.mubr.f32.mxu1 %v4117_v29  ;;  %v4120_v23 = vpop.f32.mrb[18].mxu0 }
 0x61c   :  { %1519 = vmatmul.mubr.f32.vlgmr.msra.gmra.mrb[24].mxu1 %v4115_v62  ;;  %v4123_v46 = vpop.f32.mrb[19].mxu0 }
 0x61d   :  { %1523 = vmatprep.mubr.f32.mxu1 %v4123_v46  ;;  %2769 = vmatpush3.bf16.msra.mxu1 %v3397_v32 }
 0x61e   :  { %2771 = vmatprep.subr.bf16.mxu1 %v3406_v35 }
 0x620   :  { %1524 = vmatmul.mubr.f32.gmra.mrb[26].mxu1 %v4120_v23 }
 0x621   :  { %2773 = vmatpush3.bf16.msra.mxu1 %v3416_v38 }
 0x622   :  { %2775 = vmatprep.subr.bf16.mxu1 %v3424_v42 }
 0x625   :  { %2777 = vmatpush3.bf16.msra.mxu1 %v3436_v48 }
 0x626   :  { %2779 = vmatprep.subr.bf16.mxu1 %v3442_v52 }
 0x629   :  { %2781 = vmatpush3.bf16.msra.mxu1 %v3457_v47 }
 0x62a   :  { %2783 = vmatprep.subr.bf16.mxu1 %v3460_v58 }
 0x62d   :  { %2785 = vmatpush3.bf16.msra.mxu1 %v3475_v7 }
 0x62e   :  { %2787 = vmatprep.subr.bf16.mxu1 %v3478_v8 }
 0x631   :  { %2789 = vmatpush3.bf16.msra.mxu1 %v3493_v15 }
 0x632   :  { %2791 = vmatprep.subr.bf16.mxu1 %v3496_v16 }
 0x635   :  { %2793 = vmatpush3.bf16.msra.mxu1 %v3511_v3 }
 0x636   :  { %2795 = vmatprep.subr.bf16.mxu1 %v4377_v39 }
 0x639   :  { %2797 = vmatpush3.bf16.msra.mxu1 %v4378_v37 }
 0x63a   :  { %2831 = vmatprep.subr.bf16.mxu1 %v3383_v27 }
 0x649   :  { %v4143_v14 = vpop.f32.mrb[20].mxu1  ;;  %v4145_v12 = vpop.f32.mrb[20].mxu0 }
 0x64a   :  { %v4147_v51 = vpop.f32.mrb[21].mxu1  ;;  %v4149_v45 = vpop.f32.mrb[21].mxu0 }
 0x64b   :  { %v4151_v28 = vpop.f32.mrb[22].mxu1  ;;  %v4153_v11 = vpop.f32.mrb[22].mxu0  ;;  %1593 = vmatprep.mubr.f32.mxu0 %v4147_v51  ;;  %1668 = vmatprep.mubr.f32.mxu1 %v4149_v45 }
 0x64c   :  { %v4157_v61 = vpop.f32.mrb[23].mxu1  ;;  %v4159_v0 = vpop.f32.mrb[23].mxu0  ;;  %1594 = vmatmul.mubr.f32.vlgmr.msra.gmra.mrb[24].mxu0 %v4143_v14  ;;  %1669 = vmatmul.mubr.f32.vlgmr.msra.gmra.mrb[28].mxu1 %v4145_v12 }
 0x64d   :  { %1598 = vmatprep.mubr.f32.mxu0 %v4157_v61  ;;  %1673 = vmatprep.mubr.f32.mxu1 %v4159_v0 }
 0x64e   :  { %2801 = vmatpush3.bf16.msra.mxu0 %v3248_v49  ;;  %2833 = vmatpush3.bf16.msra.mxu1 %v3542_v36 }
 0x64f   :  { %2803 = vmatprep.subr.bf16.mxu0 %v3251_v50  ;;  %2835 = vmatprep.subr.bf16.mxu1 %v3546_v40 }
 0x650   :  { %1599 = vmatmul.mubr.f32.gmra.mrb[26].mxu0 %v4151_v28  ;;  %1674 = vmatmul.mubr.f32.gmra.mrb[30].mxu1 %v4153_v11 }
 0x652   :  { %2805 = vmatpush3.bf16.msra.mxu0 %v3268_v54  ;;  %2837 = vmatpush3.bf16.msra.mxu1 %v3568_v53 }
 0x653   :  { %2807 = vmatprep.subr.bf16.mxu0 %v3271_v55  ;;  %2839 = vmatprep.subr.bf16.mxu1 %v3571_v56 }
 0x656   :  { %2809 = vmatpush3.bf16.msra.mxu0 %v3286_v59  ;;  %2841 = vmatpush3.bf16.msra.mxu1 %v3587_v1 }
 0x657   :  { %2811 = vmatprep.subr.bf16.mxu0 %v3289_v60  ;;  %2843 = vmatprep.subr.bf16.mxu1 %v3590_v9 }
 0x65a   :  { %2813 = vmatpush3.bf16.msra.mxu0 %v3304_v2  ;;  %2845 = vmatpush3.bf16.msra.mxu1 %v4359_v20 }
 0x65b   :  { %2815 = vmatprep.subr.bf16.mxu0 %v4360_v44  ;;  %2847 = vmatprep.subr.bf16.mxu1 %v4361_v21 }
 0x65e   :  { %2817 = vmatpush3.bf16.msra.mxu0 %v4362_v25  ;;  %2849 = vmatpush3.bf16.msra.mxu1 %v4363_v19 }
 0x65f   :  { %2819 = vmatprep.subr.bf16.mxu0 %v4364_v30  ;;  %2851 = vmatprep.subr.bf16.mxu1 %v4365_v31 }
 0x662   :  { %2821 = vmatpush3.bf16.msra.mxu0 %v4366_v6  ;;  %2853 = vmatpush3.bf16.msra.mxu1 %v4367_v10 }
 0x663   :  { %2823 = vmatprep.subr.bf16.mxu0 %v4368_v13  ;;  %2855 = vmatprep.subr.bf16.mxu1 %v4369_v26 }
 0x666   :  { %2825 = vmatpush3.bf16.msra.mxu0 %v4370_v41  ;;  %2857 = vmatpush3.bf16.msra.mxu1 %v4371_v5 }
 0x667   :  { %2827 = vmatprep.subr.bf16.mxu0 %v4372_v57  ;;  %2859 = vmatprep.subr.bf16.mxu1 %v4373_v4 }
 0x66a   :  { %2829 = vmatpush3.bf16.msra.mxu0 %v4374_v22  ;;  %2861 = vmatpush3.bf16.msra.mxu1 %v4375_v34 }
 0x66b   :  { %2863 = vmatprep.subr.bf16.mxu0 %v4376_v17 }
 0x6ef   :  { %v2314_v49 = vpop.f32.mrb[24].mxu1 }
 0x6f0   :  { %v2315_v50 = vpop.f32.mrb[25].mxu1 }
 0x6f1   :  { %v2316_v54 = vadd.f32 %v2315_v50, %v2314_v49 }
 0x6f3   :  { %v2317_v55 = vpop.f32.mrb[26].mxu1 }
 0x6f4   :  { %v2318_v59 = vpop.f32.mrb[27].mxu1 }
 0x6f5   :  { %v2319_v60 = vadd.f32 %v2318_v59, %v2317_v55 }
 0x71f   :  { %v2352_v2 = vpop.f32.mrb[24].mxu0  ;;  %v2390_v27 = vpop.f32.mrb[28].mxu1 }
 0x720   :  { %v2353_v36 = vpop.f32.mrb[25].mxu0  ;;  %v2391_v40 = vpop.f32.mrb[29].mxu1 }
 0x721   :  { %v2354_v53 = vadd.f32 %v2353_v36, %v2352_v2  ;;  %v2392_v56 = vadd.f32 %v2391_v40, %v2390_v27 }
 0x723   :  { %v1596_v1 = vadd.f32 %v2354_v53, %v2316_v54  ;;  %v2355_v9 = vpop.f32.mrb[26].mxu0  ;;  %v2393_v24 = vpop.f32.mrb[30].mxu1 }
 0x724   :  { %v2356_v43 = vpop.f32.mrb[27].mxu0  ;;  %v2394_v33 = vpop.f32.mrb[31].mxu1 }
 0x725   :  { %v1671_v63 = vadd.f32 %v2392_v56, %v1596_v1  ;;  %v2357_v18 = vadd.f32 %v2356_v43, %v2355_v9  ;;  %v2395_v20 = vadd.f32 %v2394_v33, %v2393_v24 }
 0x727   :  { %v1679_v44 = vmul.f32 0.001953125, %v1671_v63  ;;  %v1601_v21 = vadd.f32 %v2357_v18, %v2319_v60 }
 0x729   :  { %v1676_v25 = vadd.f32 %v2395_v20, %v1601_v21  ;;  %1683 = vperm.xlu1 %2904, %v1679_v44  }
 0x72b   :  { %v1680_v19 = vmul.f32 0.001953125, %v1676_v25 }
 0x72d   :  { %1688 = vperm.xlu0 %2903, %v1680_v19  }
 0x7a8   :  { %v1684_v30 = vpop.permute.xlu1 %1683 }
 0x7a9   :  { %v4199_v31 = vsub.f32 %v4115_v62, %v1684_v30  ;;  %v4202_v6 = vsub.f32 %v4143_v14, %v1684_v30  ;;  %v4205_v10 = vsub.f32 %v4117_v29, %v1684_v30  ;;  %v4208_v13 = vsub.f32 %v4147_v51, %v1684_v30 }
 0x7aa   :  { %v4231_v29 = vsub.f32 %v4149_v45, %v1684_v30 }
 0x7ab   :  { %v1704_v26 = vmul.f32 %v4205_v10, %v4205_v10  ;;  %v1703_v41 = vmul.f32 %v4199_v31, %v4199_v31  ;;  %v1705_v5 = vmul.f32 %v4202_v6, %v4202_v6  ;;  %v1706_v4 = vmul.f32 %v4208_v13, %v4208_v13 }
 0x7ac   :  { %v1689_v57 = vpop.permute.xlu0 %1688 }
 0x7ad   :  { %1779 = vmatprep.mubr.f32.mxu0 %v1704_v26  ;;  %v4219_v22 = vsub.f32 %v4123_v46, %v1689_v57  ;;  %v4222_v34 = vsub.f32 %v4157_v61, %v1689_v57  ;;  %v4225_v17 = vsub.f32 %v4120_v23, %v1689_v57  ;;  %v4228_v62 = vsub.f32 %v4151_v28, %v1689_v57 }
 0x7ae   :  { %1854 = vmatprep.mubr.f32.mxu1 %v1706_v4  ;;  %1780 = vmatmul.mubr.f32.vlgmr.msra.gmra.mrb[28].mxu0 %v1703_v41 }
 0x7af   :  { %1855 = vmatmul.mubr.f32.vlgmr.msra.gmra.mrb[32].mxu1 %v1705_v5  ;;  %2865 = vmatpush3.bf16.msra.mxu0 %v3397_v32  ;;  %v1710_v46 = vmul.f32 %v4219_v22, %v4219_v22  ;;  %v1712_v14 = vmul.f32 %v4222_v34, %v4222_v34  ;;  %v1709_v23 = vmul.f32 %v4225_v17, %v4225_v17 }
 0x7b0   :  { %2867 = vmatprep.subr.bf16.mxu0 %v3406_v35  ;;  %v1711_v51 = vmul.f32 %v4228_v62, %v4228_v62  ;;  %v1708_v32 = vmul.f32 %v4231_v29, %v4231_v29  ;;  %v1695_v35 = vsub.f32 %v4145_v12, %v1684_v30 }
 0x7b1   :  { %1784 = vmatprep.mubr.f32.mxu0 %v1710_v46  ;;  %1859 = vmatprep.mubr.f32.mxu1 %v1712_v14 }
 0x7b2   :  { %1785 = vmatmul.mubr.f32.gmra.mrb[30].mxu0 %v1709_v23 }
 0x7b3   :  { %1860 = vmatmul.mubr.f32.gmra.mrb[34].mxu1 %v1711_v51  ;;  %2869 = vmatpush3.bf16.msra.mxu0 %v3416_v38  ;;  %v4259_v38 = vsub.f32 %v4159_v0, %v1689_v57 }
 0x7b4   :  { %1929 = vmatprep.mubr.f32.mxu0 %v1708_v32  ;;  %2871 = vmatprep.subr.bf16.mxu0 %v3424_v42  ;;  %v1707_v42 = vmul.f32 %v1695_v35, %v1695_v35 }
 0x7b7   :  { %2873 = vmatpush3.bf16.msra.mxu0 %v3436_v48  ;;  %v1701_v48 = vsub.f32 %v4153_v11, %v1689_v57 }
 0x7b8   :  { %2875 = vmatprep.subr.bf16.mxu0 %v3442_v52  ;;  %v1714_v52 = vmul.f32 %v4259_v38, %v4259_v38 }
 0x7bb   :  { %2877 = vmatpush3.bf16.msra.mxu0 %v3457_v47  ;;  %v1713_v47 = vmul.f32 %v1701_v48, %v1701_v48 }
 0x7bc   :  { %2879 = vmatprep.subr.bf16.mxu0 %v3460_v58 }
 0x7bf   :  { %2881 = vmatpush3.bf16.msra.mxu0 %v3475_v7 }
 0x7c0   :  { %2883 = vmatprep.subr.bf16.mxu0 %v3478_v8 }
 0x7c3   :  { %2885 = vmatpush3.bf16.msra.mxu0 %v3493_v15 }
 0x7c4   :  { %2887 = vmatprep.subr.bf16.mxu0 %v3496_v16 }
 0x7c7   :  { %2889 = vmatpush3.bf16.msra.mxu0 %v3511_v3 }
 0x7c8   :  { %2891 = vmatprep.subr.bf16.mxu0 %v4377_v39 }
 0x7cb   :  { %2893 = vmatpush3.bf16.msra.mxu0 %v4378_v37 }
 0x7ce   :  { %1930 = vmatmul.mubr.f32.vlgmr.msra.gmra.mrb[32].mxu0 %v1707_v42 }
 0x7cf   :  { %1934 = vmatprep.mubr.f32.mxu0 %v1714_v52 }
 0x7d2   :  { %1935 = vmatmul.mubr.f32.gmra.mrb[34].mxu0 %v1713_v47 }
 0x881   :  { %v2428_v58 = vpop.f32.mrb[28].mxu0 }
 0x882   :  { %v2466_v7 = vpop.f32.mrb[32].mxu1  ;;  %v2429_v8 = vpop.f32.mrb[29].mxu0 }
 0x883   :  { %v2430_v15 = vadd.f32 %v2429_v8, %v2428_v58  ;;  %v2467_v16 = vpop.f32.mrb[33].mxu1 }
 0x884   :  { %v2468_v3 = vadd.f32 %v2467_v16, %v2466_v7 }
 0x885   :  { %v2431_v39 = vpop.f32.mrb[30].mxu0 }
 0x886   :  { %v1857_v12 = vadd.f32 %v2468_v3, %v2430_v15  ;;  %v2469_v45 = vpop.f32.mrb[34].mxu1  ;;  %v2432_v37 = vpop.f32.mrb[31].mxu0 }
 0x887   :  { %v2433_v28 = vadd.f32 %v2432_v37, %v2431_v39  ;;  %v2470_v61 = vpop.f32.mrb[35].mxu1 }
 0x888   :  { %v2471_v11 = vadd.f32 %v2470_v61, %v2469_v45 }
 0x88a   :  { %v1862_v0 = vadd.f32 %v2471_v11, %v2433_v28 }
 0x8a1   :  { %v2504_v49 = vpop.f32.mrb[32].mxu0 }
 0x8a2   :  { %v2505_v50 = vpop.f32.mrb[33].mxu0 }
 0x8a3   :  { %v2506_v54 = vadd.f32 %v2505_v50, %v2504_v49 }
 0x8a5   :  { %v1932_v55 = vadd.f32 %v2506_v54, %v1857_v12  ;;  %v2507_v59 = vpop.f32.mrb[34].mxu0 }
 0x8a6   :  { %v2508_v60 = vpop.f32.mrb[35].mxu0 }
 0x8a7   :  { %v1940_v2 = vmul.f32 0.001953125, %v1932_v55  ;;  %v2509_v27 = vadd.f32 %v2508_v60, %v2507_v59 }
 0x8a9   :  { %v1942_v36 = vadd.f32 1e-05, %v1940_v2  ;;  %v1937_v40 = vadd.f32 %v2509_v27, %v1862_v0 }
 0x8ab   :  { %2924 = vrsqrt.f32 %v1942_v36  ;;  %v1941_v53 = vmul.f32 0.001953125, %v1937_v40 }
 0x8ad   :  { %v1943_v56 = vadd.f32 1e-05, %v1941_v53 }
 0x8af   :  { %2926 = vrsqrt.f32 %v1943_v56 }
 0x8b5   :  { %v2925_v1 = vpop.eup %2924 }
 0x8b6   :  { %1948 = vperm.xlu1 %2904, %v2925_v1  }
 0x8b9   :  { %v2927_v9 = vpop.eup %2926 }
 0x8ba   :  { %1953 = vperm.xlu0 %2903, %v2927_v9  }
 0x935   :  { %v1949_v24 = vpop.permute.xlu1 %1948 }
 0x936   :  { %v1956_v43 = vmul.f32 %v1949_v24, %v4199_v31  ;;  %v1957_v33 = vmul.f32 %v1949_v24, %v4205_v10  ;;  %v1958_v63 = vmul.f32 %v1949_v24, %v4202_v6  ;;  %v1959_v18 = vmul.f32 %v1949_v24, %v4208_v13 }
 0x937   :  { %v1960_v20 = vmul.f32 %v1949_v24, %v1695_v35  ;;  %v1961_v44 = vmul.f32 %v1949_v24, %v4231_v29 }
 0x938   :  { %v1968_v21 = vmax.f32 %v1956_v43, 0.0  ;;  %v1969_v25 = vmax.f32 %v1957_v33, 0.0  ;;  %v1970_v19 = vmax.f32 %v1958_v63, 0.0  ;;  %v1971_v30 = vmax.f32 %v1959_v18, 0.0 }
 0x939   :  { %v1972_v26 = vmax.f32 %v1960_v20, 0.0  ;;  %v1973_v41 = vmax.f32 %v1961_v44, 0.0  ;;  %v1954_v5 = vpop.permute.xlu0 %1953 }
 0x93a   :  { %v2048_v57 = vpack.c.bf16 %v1969_v25, %v1968_v21  ;;  %v2049_v4 = vpack.c.bf16 %v1971_v30, %v1970_v19  ;;  %v1962_v31 = vmul.f32 %v1954_v5, %v4225_v17  ;;  %v1963_v10 = vmul.f32 %v1954_v5, %v4219_v22 }
 0x93b   :  { %v2050_v46 = vpack.c.bf16 %v1973_v41, %v1972_v26  ;;  %v1964_v6 = vmul.f32 %v1954_v5, %v4228_v62  ;;  %v1965_v13 = vmul.f32 %v1954_v5, %v4222_v34  ;;  %v1966_v14 = vmul.f32 %v1954_v5, %v1701_v48 }
 0x93c   :  { %2016 = vst [vmem:[%s4298_s5] sm:$0xff] %v2048_v57  ;;  %2017 = vst [vmem:[%s4298_s5 + $0x8] sm:$0xff] %v2049_v4  ;;  %v1967_v29 = vmul.f32 %v1954_v5, %v4259_v38  ;;  %v1974_v23 = vmax.f32 %v1962_v31, 0.0  ;;  %v1975_v17 = vmax.f32 %v1963_v10, 0.0 }
 0x93d   :  { %2018 = vst [vmem:[%s4298_s5 + $0x10] sm:$0xff] %v2050_v46  ;;  %v1976_v22 = vmax.f32 %v1964_v6, 0.0  ;;  %v1977_v62 = vmax.f32 %v1965_v13, 0.0  ;;  %v1978_v34 = vmax.f32 %v1966_v14, 0.0 }
 0x93e   :  { %v1979_v51 = vmax.f32 %v1967_v29, 0.0  ;;  %v2051_v32 = vpack.c.bf16 %v1975_v17, %v1974_v23 }
 0x93f   :  { %v2052_v35 = vpack.c.bf16 %v1977_v62, %v1976_v22 }
 0x940   :  { %v2053_v42 = vpack.c.bf16 %v1979_v51, %v1978_v34  ;;  %2019 = vst [vmem:[%s4298_s5 + $0x18] sm:$0xff] %v2051_v32 }
 0x941   :  { %2020 = vst [vmem:[%s4298_s5 + $0x20] sm:$0xff] %v2052_v35 }
 0x942   :  { %2021 = vst [vmem:[%s4298_s5 + $0x28] sm:$0xff] %v2053_v42 }

</bundles_post_ra>
